<compile_context>
chip_gen: v6e
topology: v6e:2x2x1
jax: 0.10.0
libtpu: 0.0.40
codegen_flags: <defaults>
</compile_context>

<pallas_src>
import jax
import jax.numpy as jnp
from jax.experimental import pallas as pl
from jax.experimental.pallas import tpu as pltpu

C_IN = 16
C_OUT = 16
K = 64
STRIDE = 2
HALF_K = K // STRIDE          # 32 taps per phase
CONTRACT = HALF_K * C_IN      # 512 contraction depth per phase


def conv1d_relu_kernel(x_ref, w_ref, b_ref, o_ref, slab_ref):
    # x_ref   : (2, C_in, L_half)      phase-split input, length in the lane dim
    # w_ref   : (2, C_out, 32*C_in)    per-phase weights, contraction index = m*C_in + ci
    # b_ref   : (C_out, 1)
    # o_ref   : (C_out, L_out)
    # slab_ref: VMEM scratch (2, 32*C_in, L_out) holding the im2col slabs
    l_out = o_ref.shape[1]

    # Assemble the two im2col slabs: slab[p, m*C_in + ci, t] = x_phase_p[ci, t + m].
    # Source slices are lane-offset only; destination rows are 16-aligned sublanes.
    for p in range(2):
        xp = x_ref[p]                                        # (C_in, L_half)
        for m in range(HALF_K):
            slab_ref[p, m * C_IN:(m + 1) * C_IN, :] = xp[:, m:m + l_out]

    # 2 large-contraction MXU matmuls + bias + ReLU, accumulated in fp32.
    acc = jnp.broadcast_to(b_ref[...], (C_OUT, l_out)).astype(jnp.float32)
    acc = acc + jnp.dot(w_ref[0], slab_ref[0], preferred_element_type=jnp.float32)
    acc = acc + jnp.dot(w_ref[1], slab_ref[1], preferred_element_type=jnp.float32)

    o_ref[...] = jnp.maximum(acc, 0.0).astype(o_ref.dtype)


def feature_block1(x_ncl, weight, bias):
    """x_ncl: (N, C_in, L) float32; weight: (C_out, C_in, K); bias: (C_out,)."""
    n, c_in, l = x_ncl.shape
    assert c_in == C_IN
    l_out = (l - K) // STRIDE + 1
    l_used = STRIDE * (l_out - 1) + K          # input samples actually read (always even)
    l_half = l_used // 2                       # = l_out + 31

    # Layout-only glue: deinterleave the two stride-2 phases, keep length in lanes.
    # x_ph[n, p, ci, j] = x[n, ci, 2*j + p]
    x_ph = x_ncl[:, :, :l_used].reshape(n, c_in, l_half, 2).transpose(0, 3, 1, 2)

    # Weights (C_out, C_in, K) -> (2, C_out, 32*C_in): w_b[p, co, m*C_in+ci] = w[co, ci, 2m+p]
    w_b = (weight.reshape(C_OUT, C_IN, HALF_K, 2)
                 .transpose(3, 0, 2, 1)
                 .reshape(2, C_OUT, CONTRACT))
    b2 = bias.reshape(C_OUT, 1)

    # Output is emitted directly in NCL layout (N, C_out, L_out): no post-transpose.
    return pl.pallas_call(
        conv1d_relu_kernel,
        out_shape=jax.ShapeDtypeStruct((n, C_OUT, l_out), x_ncl.dtype),
        grid_spec=pltpu.PrefetchScalarGridSpec(
            num_scalar_prefetch=0,
            grid=(n,),
            in_specs=[
                pl.BlockSpec((None, 2, C_IN, l_half), lambda i: (i, 0, 0, 0)),
                pl.BlockSpec((2, C_OUT, CONTRACT), lambda i: (0, 0, 0)),
                pl.BlockSpec((C_OUT, 1), lambda i: (0, 0)),
            ],
            out_specs=pl.BlockSpec((None, C_OUT, l_out), lambda i: (i, 0, 0)),
            scratch_shapes=[pltpu.VMEM((2, CONTRACT, l_out), jnp.float32)],
        ),
        compiler_params=pltpu.CompilerParams(
            dimension_semantics=("parallel",)),
    )(x_ph, w_b, b2)


if __name__ == "__main__":
    key = jax.random.PRNGKey(0)
    kx, kw, kb = jax.random.split(key, 3)

    N, L = 2, 190                              # L_out = (190 - 64)//2 + 1 = 64
    x = jax.random.normal(kx, (N, C_IN, L), dtype=jnp.float32)
    # Deterministic synthetic parameters (shapes per nn.Conv1d(16, 16, 64)).
    weight = jax.random.normal(kw, (C_OUT, C_IN, K), dtype=jnp.float32) * 0.05
    bias = jax.random.normal(kb, (C_OUT,), dtype=jnp.float32) * 0.05

    out = jax.jit(feature_block1)(x, weight, bias)
    out = jax.block_until_ready(out)

    # Reference check against XLA's conv (same semantics as the PyTorch module).
    ref = jax.lax.conv_general_dilated(
        x, weight, window_strides=(STRIDE,), padding="VALID",
        dimension_numbers=("NCH", "OIH", "NCH"))
    ref = jnp.maximum(ref + bias[None, :, None], 0.0)
    assert out.shape == (N, C_OUT, (L - K) // STRIDE + 1)
    assert jnp.allclose(out, ref, atol=1e-3, rtol=1e-3), "mismatch vs reference conv"

    print("KERNEL_OK")
</pallas_src>

<mosaic_0001>
module attributes {stable_mosaic.version = 11 : i64} {
  func.func @conv1d_relu_kernel(%arg0: i32, %arg1: memref<1x2x16x95xf32, #tpu.memory_space<vmem>>, %arg2: memref<2x16x512xf32, #tpu.memory_space<vmem>>, %arg3: memref<16x1xf32, #tpu.memory_space<vmem>>, %arg4: memref<1x16x64xf32, #tpu.memory_space<vmem>>, %arg5: memref<2x512x64xf32, #tpu.memory_space<vmem>>) attributes {dimension_semantics = [#tpu.dimension_semantics<parallel>], iteration_bounds = array<i64: 2>, scalar_prefetch = 0 : i64, scratch_operands = 1 : i64, tpu.core_type = #tpu.core_type<tc>, window_params = [{transform_indices = @transform_0, window_bounds = array<i64: 1, 2, 16, 95>}, {pipeline_mode = #tpu.pipeline_mode<synchronous>, transform_indices = @transform_1, window_bounds = array<i64: 2, 16, 512>}, {pipeline_mode = #tpu.pipeline_mode<synchronous>, transform_indices = @transform_2, window_bounds = array<i64: 16, 1>}, {transform_indices = @transform_3, window_bounds = array<i64: 1, 16, 64>}]} {
    %c0 = arith.constant 0 : index
    %c0_0 = arith.constant 0 : index
    %c0_1 = arith.constant 0 : index
    %c0_2 = arith.constant 0 : index
    %0 = vector.load %arg1[%c0, %c0_0, %c0_1, %c0_2] : memref<1x2x16x95xf32, #tpu.memory_space<vmem>>, vector<1x1x16x95xf32>
    %1 = vector.shape_cast %0 : vector<1x1x16x95xf32> to vector<16x95xf32>
    %2 = vector.extract_strided_slice %1 {offsets = [0, 0], sizes = [16, 64], strides = [1, 1]} : vector<16x95xf32> to vector<16x64xf32>
    %c0_3 = arith.constant 0 : index
    %c0_4 = arith.constant 0 : index
    %c0_5 = arith.constant 0 : index
    %3 = vector.load %arg5[%c0_3, %c0_4, %c0_5] : memref<2x512x64xf32, #tpu.memory_space<vmem>>, vector<1x16x64xf32>
    %4 = vector.shape_cast %3 : vector<1x16x64xf32> to vector<16x64xf32>
    %5 = vector.shape_cast %2 : vector<16x64xf32> to vector<1x16x64xf32>
    tpu.vector_store %arg5[%c0_3, %c0_4, %c0_5], %5 {strides = array<i32>} : memref<2x512x64xf32, #tpu.memory_space<vmem>>, vector<1x16x64xf32>,
    %6 = vector.extract_strided_slice %1 {offsets = [0, 1], sizes = [16, 64], strides = [1, 1]} : vector<16x95xf32> to vector<16x64xf32>
    %c0_6 = arith.constant 0 : index
    %c16 = arith.constant 16 : index
    %c0_7 = arith.constant 0 : index
    %7 = vector.load %arg5[%c0_6, %c16, %c0_7] : memref<2x512x64xf32, #tpu.memory_space<vmem>>, vector<1x16x64xf32>
    %8 = vector.shape_cast %7 : vector<1x16x64xf32> to vector<16x64xf32>
    %9 = vector.shape_cast %6 : vector<16x64xf32> to vector<1x16x64xf32>
    tpu.vector_store %arg5[%c0_6, %c16, %c0_7], %9 {strides = array<i32>} : memref<2x512x64xf32, #tpu.memory_space<vmem>>, vector<1x16x64xf32>,
    %10 = vector.extract_strided_slice %1 {offsets = [0, 2], sizes = [16, 64], strides = [1, 1]} : vector<16x95xf32> to vector<16x64xf32>
    %c0_8 = arith.constant 0 : index
    %c32 = arith.constant 32 : index
    %c0_9 = arith.constant 0 : index
    %11 = vector.load %arg5[%c0_8, %c32, %c0_9] : memref<2x512x64xf32, #tpu.memory_space<vmem>>, vector<1x16x64xf32>
    %12 = vector.shape_cast %11 : vector<1x16x64xf32> to vector<16x64xf32>
    %13 = vector.shape_cast %10 : vector<16x64xf32> to vector<1x16x64xf32>
    tpu.vector_store %arg5[%c0_8, %c32, %c0_9], %13 {strides = array<i32>} : memref<2x512x64xf32, #tpu.memory_space<vmem>>, vector<1x16x64xf32>,
    %14 = vector.extract_strided_slice %1 {offsets = [0, 3], sizes = [16, 64], strides = [1, 1]} : vector<16x95xf32> to vector<16x64xf32>
    %c0_10 = arith.constant 0 : index
    %c48 = arith.constant 48 : index
    %c0_11 = arith.constant 0 : index
    %15 = vector.load %arg5[%c0_10, %c48, %c0_11] : memref<2x512x64xf32, #tpu.memory_space<vmem>>, vector<1x16x64xf32>
    %16 = vector.shape_cast %15 : vector<1x16x64xf32> to vector<16x64xf32>
    %17 = vector.shape_cast %14 : vector<16x64xf32> to vector<1x16x64xf32>
    tpu.vector_store %arg5[%c0_10, %c48, %c0_11], %17 {strides = array<i32>} : memref<2x512x64xf32, #tpu.memory_space<vmem>>, vector<1x16x64xf32>,
    %18 = vector.extract_strided_slice %1 {offsets = [0, 4], sizes = [16, 64], strides = [1, 1]} : vector<16x95xf32> to vector<16x64xf32>
    %c0_12 = arith.constant 0 : index
    %c64 = arith.constant 64 : index
    %c0_13 = arith.constant 0 : index
    %19 = vector.load %arg5[%c0_12, %c64, %c0_13] : memref<2x512x64xf32, #tpu.memory_space<vmem>>, vector<1x16x64xf32>
    %20 = vector.shape_cast %19 : vector<1x16x64xf32> to vector<16x64xf32>
    %21 = vector.shape_cast %18 : vector<16x64xf32> to vector<1x16x64xf32>
    tpu.vector_store %arg5[%c0_12, %c64, %c0_13], %21 {strides = array<i32>} : memref<2x512x64xf32, #tpu.memory_space<vmem>>, vector<1x16x64xf32>,
    %22 = vector.extract_strided_slice %1 {offsets = [0, 5], sizes = [16, 64], strides = [1, 1]} : vector<16x95xf32> to vector<16x64xf32>
    %c0_14 = arith.constant 0 : index
    %c80 = arith.constant 80 : index
    %c0_15 = arith.constant 0 : index
    %23 = vector.load %arg5[%c0_14, %c80, %c0_15] : memref<2x512x64xf32, #tpu.memory_space<vmem>>, vector<1x16x64xf32>
    %24 = vector.shape_cast %23 : vector<1x16x64xf32> to vector<16x64xf32>
    %25 = vector.shape_cast %22 : vector<16x64xf32> to vector<1x16x64xf32>
    tpu.vector_store %arg5[%c0_14, %c80, %c0_15], %25 {strides = array<i32>} : memref<2x512x64xf32, #tpu.memory_space<vmem>>, vector<1x16x64xf32>,
    %26 = vector.extract_strided_slice %1 {offsets = [0, 6], sizes = [16, 64], strides = [1, 1]} : vector<16x95xf32> to vector<16x64xf32>
    %c0_16 = arith.constant 0 : index
    %c96 = arith.constant 96 : index
    %c0_17 = arith.constant 0 : index
    %27 = vector.load %arg5[%c0_16, %c96, %c0_17] : memref<2x512x64xf32, #tpu.memory_space<vmem>>, vector<1x16x64xf32>
    %28 = vector.shape_cast %27 : vector<1x16x64xf32> to vector<16x64xf32>
    %29 = vector.shape_cast %26 : vector<16x64xf32> to vector<1x16x64xf32>
    tpu.vector_store %arg5[%c0_16, %c96, %c0_17], %29 {strides = array<i32>} : memref<2x512x64xf32, #tpu.memory_space<vmem>>, vector<1x16x64xf32>,
    %30 = vector.extract_strided_slice %1 {offsets = [0, 7], sizes = [16, 64], strides = [1, 1]} : vector<16x95xf32> to vector<16x64xf32>
    %c0_18 = arith.constant 0 : index
    %c112 = arith.constant 112 : index
    %c0_19 = arith.constant 0 : index
    %31 = vector.load %arg5[%c0_18, %c112, %c0_19] : memref<2x512x64xf32, #tpu.memory_space<vmem>>, vector<1x16x64xf32>
    %32 = vector.shape_cast %31 : vector<1x16x64xf32> to vector<16x64xf32>
    %33 = vector.shape_cast %30 : vector<16x64xf32> to vector<1x16x64xf32>
    tpu.vector_store %arg5[%c0_18, %c112, %c0_19], %33 {strides = array<i32>} : memref<2x512x64xf32, #tpu.memory_space<vmem>>, vector<1x16x64xf32>,
    %34 = vector.extract_strided_slice %1 {offsets = [0, 8], sizes = [16, 64], strides = [1, 1]} : vector<16x95xf32> to vector<16x64xf32>
    %c0_20 = arith.constant 0 : index
    %c128 = arith.constant 128 : index
    %c0_21 = arith.constant 0 : index
    %35 = vector.load %arg5[%c0_20, %c128, %c0_21] : memref<2x512x64xf32, #tpu.memory_space<vmem>>, vector<1x16x64xf32>
    %36 = vector.shape_cast %35 : vector<1x16x64xf32> to vector<16x64xf32>
    %37 = vector.shape_cast %34 : vector<16x64xf32> to vector<1x16x64xf32>
    tpu.vector_store %arg5[%c0_20, %c128, %c0_21], %37 {strides = array<i32>} : memref<2x512x64xf32, #tpu.memory_space<vmem>>, vector<1x16x64xf32>,
    %38 = vector.extract_strided_slice %1 {offsets = [0, 9], sizes = [16, 64], strides = [1, 1]} : vector<16x95xf32> to vector<16x64xf32>
    %c0_22 = arith.constant 0 : index
    %c144 = arith.constant 144 : index
    %c0_23 = arith.constant 0 : index
    %39 = vector.load %arg5[%c0_22, %c144, %c0_23] : memref<2x512x64xf32, #tpu.memory_space<vmem>>, vector<1x16x64xf32>
    %40 = vector.shape_cast %39 : vector<1x16x64xf32> to vector<16x64xf32>
    %41 = vector.shape_cast %38 : vector<16x64xf32> to vector<1x16x64xf32>
    tpu.vector_store %arg5[%c0_22, %c144, %c0_23], %41 {strides = array<i32>} : memref<2x512x64xf32, #tpu.memory_space<vmem>>, vector<1x16x64xf32>,
    %42 = vector.extract_strided_slice %1 {offsets = [0, 10], sizes = [16, 64], strides = [1, 1]} : vector<16x95xf32> to vector<16x64xf32>
    %c0_24 = arith.constant 0 : index
    %c160 = arith.constant 160 : index
    %c0_25 = arith.constant 0 : index
    %43 = vector.load %arg5[%c0_24, %c160, %c0_25] : memref<2x512x64xf32, #tpu.memory_space<vmem>>, vector<1x16x64xf32>
    %44 = vector.shape_cast %43 : vector<1x16x64xf32> to vector<16x64xf32>
    %45 = vector.shape_cast %42 : vector<16x64xf32> to vector<1x16x64xf32>
    tpu.vector_store %arg5[%c0_24, %c160, %c0_25], %45 {strides = array<i32>} : memref<2x512x64xf32, #tpu.memory_space<vmem>>, vector<1x16x64xf32>,
    %46 = vector.extract_strided_slice %1 {offsets = [0, 11], sizes = [16, 64], strides = [1, 1]} : vector<16x95xf32> to vector<16x64xf32>
    %c0_26 = arith.constant 0 : index
    %c176 = arith.constant 176 : index
    %c0_27 = arith.constant 0 : index
    %47 = vector.load %arg5[%c0_26, %c176, %c0_27] : memref<2x512x64xf32, #tpu.memory_space<vmem>>, vector<1x16x64xf32>
    %48 = vector.shape_cast %47 : vector<1x16x64xf32> to vector<16x64xf32>
    %49 = vector.shape_cast %46 : vector<16x64xf32> to vector<1x16x64xf32>
    tpu.vector_store %arg5[%c0_26, %c176, %c0_27], %49 {strides = array<i32>} : memref<2x512x64xf32, #tpu.memory_space<vmem>>, vector<1x16x64xf32>,
    %50 = vector.extract_strided_slice %1 {offsets = [0, 12], sizes = [16, 64], strides = [1, 1]} : vector<16x95xf32> to vector<16x64xf32>
    %c0_28 = arith.constant 0 : index
    %c192 = arith.constant 192 : index
    %c0_29 = arith.constant 0 : index
    %51 = vector.load %arg5[%c0_28, %c192, %c0_29] : memref<2x512x64xf32, #tpu.memory_space<vmem>>, vector<1x16x64xf32>
    %52 = vector.shape_cast %51 : vector<1x16x64xf32> to vector<16x64xf32>
    %53 = vector.shape_cast %50 : vector<16x64xf32> to vector<1x16x64xf32>
    tpu.vector_store %arg5[%c0_28, %c192, %c0_29], %53 {strides = array<i32>} : memref<2x512x64xf32, #tpu.memory_space<vmem>>, vector<1x16x64xf32>,
    %54 = vector.extract_strided_slice %1 {offsets = [0, 13], sizes = [16, 64], strides = [1, 1]} : vector<16x95xf32> to vector<16x64xf32>
    %c0_30 = arith.constant 0 : index
    %c208 = arith.constant 208 : index
    %c0_31 = arith.constant 0 : index
    %55 = vector.load %arg5[%c0_30, %c208, %c0_31] : memref<2x512x64xf32, #tpu.memory_space<vmem>>, vector<1x16x64xf32>
    %56 = vector.shape_cast %55 : vector<1x16x64xf32> to vector<16x64xf32>
    %57 = vector.shape_cast %54 : vector<16x64xf32> to vector<1x16x64xf32>
    tpu.vector_store %arg5[%c0_30, %c208, %c0_31], %57 {strides = array<i32>} : memref<2x512x64xf32, #tpu.memory_space<vmem>>, vector<1x16x64xf32>,
    %58 = vector.extract_strided_slice %1 {offsets = [0, 14], sizes = [16, 64], strides = [1, 1]} : vector<16x95xf32> to vector<16x64xf32>
    %c0_32 = arith.constant 0 : index
    %c224 = arith.constant 224 : index
    %c0_33 = arith.constant 0 : index
    %59 = vector.load %arg5[%c0_32, %c224, %c0_33] : memref<2x512x64xf32, #tpu.memory_space<vmem>>, vector<1x16x64xf32>
    %60 = vector.shape_cast %59 : vector<1x16x64xf32> to vector<16x64xf32>
    %61 = vector.shape_cast %58 : vector<16x64xf32> to vector<1x16x64xf32>
    tpu.vector_store %arg5[%c0_32, %c224, %c0_33], %61 {strides = array<i32>} : memref<2x512x64xf32, #tpu.memory_space<vmem>>, vector<1x16x64xf32>,
    %62 = vector.extract_strided_slice %1 {offsets = [0, 15], sizes = [16, 64], strides = [1, 1]} : vector<16x95xf32> to vector<16x64xf32>
    %c0_34 = arith.constant 0 : index
    %c240 = arith.constant 240 : index
    %c0_35 = arith.constant 0 : index
    %63 = vector.load %arg5[%c0_34, %c240, %c0_35] : memref<2x512x64xf32, #tpu.memory_space<vmem>>, vector<1x16x64xf32>
    %64 = vector.shape_cast %63 : vector<1x16x64xf32> to vector<16x64xf32>
    %65 = vector.shape_cast %62 : vector<16x64xf32> to vector<1x16x64xf32>
    tpu.vector_store %arg5[%c0_34, %c240, %c0_35], %65 {strides = array<i32>} : memref<2x512x64xf32, #tpu.memory_space<vmem>>, vector<1x16x64xf32>,
    %66 = vector.extract_strided_slice %1 {offsets = [0, 16], sizes = [16, 64], strides = [1, 1]} : vector<16x95xf32> to vector<16x64xf32>
    %c0_36 = arith.constant 0 : index
    %c256 = arith.constant 256 : index
    %c0_37 = arith.constant 0 : index
    %67 = vector.load %arg5[%c0_36, %c256, %c0_37] : memref<2x512x64xf32, #tpu.memory_space<vmem>>, vector<1x16x64xf32>
    %68 = vector.shape_cast %67 : vector<1x16x64xf32> to vector<16x64xf32>
    %69 = vector.shape_cast %66 : vector<16x64xf32> to vector<1x16x64xf32>
    tpu.vector_store %arg5[%c0_36, %c256, %c0_37], %69 {strides = array<i32>} : memref<2x512x64xf32, #tpu.memory_space<vmem>>, vector<1x16x64xf32>,
    %70 = vector.extract_strided_slice %1 {offsets = [0, 17], sizes = [16, 64], strides = [1, 1]} : vector<16x95xf32> to vector<16x64xf32>
    %c0_38 = arith.constant 0 : index
    %c272 = arith.constant 272 : index
    %c0_39 = arith.constant 0 : index
    %71 = vector.load %arg5[%c0_38, %c272, %c0_39] : memref<2x512x64xf32, #tpu.memory_space<vmem>>, vector<1x16x64xf32>
    %72 = vector.shape_cast %71 : vector<1x16x64xf32> to vector<16x64xf32>
    %73 = vector.shape_cast %70 : vector<16x64xf32> to vector<1x16x64xf32>
    tpu.vector_store %arg5[%c0_38, %c272, %c0_39], %73 {strides = array<i32>} : memref<2x512x64xf32, #tpu.memory_space<vmem>>, vector<1x16x64xf32>,
    %74 = vector.extract_strided_slice %1 {offsets = [0, 18], sizes = [16, 64], strides = [1, 1]} : vector<16x95xf32> to vector<16x64xf32>
    %c0_40 = arith.constant 0 : index
    %c288 = arith.constant 288 : index
    %c0_41 = arith.constant 0 : index
    %75 = vector.load %arg5[%c0_40, %c288, %c0_41] : memref<2x512x64xf32, #tpu.memory_space<vmem>>, vector<1x16x64xf32>
    %76 = vector.shape_cast %75 : vector<1x16x64xf32> to vector<16x64xf32>
    %77 = vector.shape_cast %74 : vector<16x64xf32> to vector<1x16x64xf32>
    tpu.vector_store %arg5[%c0_40, %c288, %c0_41], %77 {strides = array<i32>} : memref<2x512x64xf32, #tpu.memory_space<vmem>>, vector<1x16x64xf32>,
    %78 = vector.extract_strided_slice %1 {offsets = [0, 19], sizes = [16, 64], strides = [1, 1]} : vector<16x95xf32> to vector<16x64xf32>
    %c0_42 = arith.constant 0 : index
    %c304 = arith.constant 304 : index
    %c0_43 = arith.constant 0 : index
    %79 = vector.load %arg5[%c0_42, %c304, %c0_43] : memref<2x512x64xf32, #tpu.memory_space<vmem>>, vector<1x16x64xf32>
    %80 = vector.shape_cast %79 : vector<1x16x64xf32> to vector<16x64xf32>
    %81 = vector.shape_cast %78 : vector<16x64xf32> to vector<1x16x64xf32>
    tpu.vector_store %arg5[%c0_42, %c304, %c0_43], %81 {strides = array<i32>} : memref<2x512x64xf32, #tpu.memory_space<vmem>>, vector<1x16x64xf32>,
    %82 = vector.extract_strided_slice %1 {offsets = [0, 20], sizes = [16, 64], strides = [1, 1]} : vector<16x95xf32> to vector<16x64xf32>
    %c0_44 = arith.constant 0 : index
    %c320 = arith.constant 320 : index
    %c0_45 = arith.constant 0 : index
    %83 = vector.load %arg5[%c0_44, %c320, %c0_45] : memref<2x512x64xf32, #tpu.memory_space<vmem>>, vector<1x16x64xf32>
    %84 = vector.shape_cast %83 : vector<1x16x64xf32> to vector<16x64xf32>
    %85 = vector.shape_cast %82 : vector<16x64xf32> to vector<1x16x64xf32>
    tpu.vector_store %arg5[%c0_44, %c320, %c0_45], %85 {strides = array<i32>} : memref<2x512x64xf32, #tpu.memory_space<vmem>>, vector<1x16x64xf32>,
    %86 = vector.extract_strided_slice %1 {offsets = [0, 21], sizes = [16, 64], strides = [1, 1]} : vector<16x95xf32> to vector<16x64xf32>
    %c0_46 = arith.constant 0 : index
    %c336 = arith.constant 336 : index
    %c0_47 = arith.constant 0 : index
    %87 = vector.load %arg5[%c0_46, %c336, %c0_47] : memref<2x512x64xf32, #tpu.memory_space<vmem>>, vector<1x16x64xf32>
    %88 = vector.shape_cast %87 : vector<1x16x64xf32> to vector<16x64xf32>
    %89 = vector.shape_cast %86 : vector<16x64xf32> to vector<1x16x64xf32>
    tpu.vector_store %arg5[%c0_46, %c336, %c0_47], %89 {strides = array<i32>} : memref<2x512x64xf32, #tpu.memory_space<vmem>>, vector<1x16x64xf32>,
    %90 = vector.extract_strided_slice %1 {offsets = [0, 22], sizes = [16, 64], strides = [1, 1]} : vector<16x95xf32> to vector<16x64xf32>
    %c0_48 = arith.constant 0 : index
    %c352 = arith.constant 352 : index
    %c0_49 = arith.constant 0 : index
    %91 = vector.load %arg5[%c0_48, %c352, %c0_49] : memref<2x512x64xf32, #tpu.memory_space<vmem>>, vector<1x16x64xf32>
    %92 = vector.shape_cast %91 : vector<1x16x64xf32> to vector<16x64xf32>
    %93 = vector.shape_cast %90 : vector<16x64xf32> to vector<1x16x64xf32>
    tpu.vector_store %arg5[%c0_48, %c352, %c0_49], %93 {strides = array<i32>} : memref<2x512x64xf32, #tpu.memory_space<vmem>>, vector<1x16x64xf32>,
    %94 = vector.extract_strided_slice %1 {offsets = [0, 23], sizes = [16, 64], strides = [1, 1]} : vector<16x95xf32> to vector<16x64xf32>
    %c0_50 = arith.constant 0 : index
    %c368 = arith.constant 368 : index
    %c0_51 = arith.constant 0 : index
    %95 = vector.load %arg5[%c0_50, %c368, %c0_51] : memref<2x512x64xf32, #tpu.memory_space<vmem>>, vector<1x16x64xf32>
    %96 = vector.shape_cast %95 : vector<1x16x64xf32> to vector<16x64xf32>
    %97 = vector.shape_cast %94 : vector<16x64xf32> to vector<1x16x64xf32>
    tpu.vector_store %arg5[%c0_50, %c368, %c0_51], %97 {strides = array<i32>} : memref<2x512x64xf32, #tpu.memory_space<vmem>>, vector<1x16x64xf32>,
    %98 = vector.extract_strided_slice %1 {offsets = [0, 24], sizes = [16, 64], strides = [1, 1]} : vector<16x95xf32> to vector<16x64xf32>
    %c0_52 = arith.constant 0 : index
    %c384 = arith.constant 384 : index
    %c0_53 = arith.constant 0 : index
    %99 = vector.load %arg5[%c0_52, %c384, %c0_53] : memref<2x512x64xf32, #tpu.memory_space<vmem>>, vector<1x16x64xf32>
    %100 = vector.shape_cast %99 : vector<1x16x64xf32> to vector<16x64xf32>
    %101 = vector.shape_cast %98 : vector<16x64xf32> to vector<1x16x64xf32>
    tpu.vector_store %arg5[%c0_52, %c384, %c0_53], %101 {strides = array<i32>} : memref<2x512x64xf32, #tpu.memory_space<vmem>>, vector<1x16x64xf32>,
    %102 = vector.extract_strided_slice %1 {offsets = [0, 25], sizes = [16, 64], strides = [1, 1]} : vector<16x95xf32> to vector<16x64xf32>
    %c0_54 = arith.constant 0 : index
    %c400 = arith.constant 400 : index
    %c0_55 = arith.constant 0 : index
    %103 = vector.load %arg5[%c0_54, %c400, %c0_55] : memref<2x512x64xf32, #tpu.memory_space<vmem>>, vector<1x16x64xf32>
    %104 = vector.shape_cast %103 : vector<1x16x64xf32> to vector<16x64xf32>
    %105 = vector.shape_cast %102 : vector<16x64xf32> to vector<1x16x64xf32>
    tpu.vector_store %arg5[%c0_54, %c400, %c0_55], %105 {strides = array<i32>} : memref<2x512x64xf32, #tpu.memory_space<vmem>>, vector<1x16x64xf32>,
    %106 = vector.extract_strided_slice %1 {offsets = [0, 26], sizes = [16, 64], strides = [1, 1]} : vector<16x95xf32> to vector<16x64xf32>
    %c0_56 = arith.constant 0 : index
    %c416 = arith.constant 416 : index
    %c0_57 = arith.constant 0 : index
    %107 = vector.load %arg5[%c0_56, %c416, %c0_57] : memref<2x512x64xf32, #tpu.memory_space<vmem>>, vector<1x16x64xf32>
    %108 = vector.shape_cast %107 : vector<1x16x64xf32> to vector<16x64xf32>
    %109 = vector.shape_cast %106 : vector<16x64xf32> to vector<1x16x64xf32>
    tpu.vector_store %arg5[%c0_56, %c416, %c0_57], %109 {strides = array<i32>} : memref<2x512x64xf32, #tpu.memory_space<vmem>>, vector<1x16x64xf32>,
    %110 = vector.extract_strided_slice %1 {offsets = [0, 27], sizes = [16, 64], strides = [1, 1]} : vector<16x95xf32> to vector<16x64xf32>
    %c0_58 = arith.constant 0 : index
    %c432 = arith.constant 432 : index
    %c0_59 = arith.constant 0 : index
    %111 = vector.load %arg5[%c0_58, %c432, %c0_59] : memref<2x512x64xf32, #tpu.memory_space<vmem>>, vector<1x16x64xf32>
    %112 = vector.shape_cast %111 : vector<1x16x64xf32> to vector<16x64xf32>
    %113 = vector.shape_cast %110 : vector<16x64xf32> to vector<1x16x64xf32>
    tpu.vector_store %arg5[%c0_58, %c432, %c0_59], %113 {strides = array<i32>} : memref<2x512x64xf32, #tpu.memory_space<vmem>>, vector<1x16x64xf32>,
    %114 = vector.extract_strided_slice %1 {offsets = [0, 28], sizes = [16, 64], strides = [1, 1]} : vector<16x95xf32> to vector<16x64xf32>
    %c0_60 = arith.constant 0 : index
    %c448 = arith.constant 448 : index
    %c0_61 = arith.constant 0 : index
    %115 = vector.load %arg5[%c0_60, %c448, %c0_61] : memref<2x512x64xf32, #tpu.memory_space<vmem>>, vector<1x16x64xf32>
    %116 = vector.shape_cast %115 : vector<1x16x64xf32> to vector<16x64xf32>
    %117 = vector.shape_cast %114 : vector<16x64xf32> to vector<1x16x64xf32>
    tpu.vector_store %arg5[%c0_60, %c448, %c0_61], %117 {strides = array<i32>} : memref<2x512x64xf32, #tpu.memory_space<vmem>>, vector<1x16x64xf32>,
    %118 = vector.extract_strided_slice %1 {offsets = [0, 29], sizes = [16, 64], strides = [1, 1]} : vector<16x95xf32> to vector<16x64xf32>
    %c0_62 = arith.constant 0 : index
    %c464 = arith.constant 464 : index
    %c0_63 = arith.constant 0 : index
    %119 = vector.load %arg5[%c0_62, %c464, %c0_63] : memref<2x512x64xf32, #tpu.memory_space<vmem>>, vector<1x16x64xf32>
    %120 = vector.shape_cast %119 : vector<1x16x64xf32> to vector<16x64xf32>
    %121 = vector.shape_cast %118 : vector<16x64xf32> to vector<1x16x64xf32>
    tpu.vector_store %arg5[%c0_62, %c464, %c0_63], %121 {strides = array<i32>} : memref<2x512x64xf32, #tpu.memory_space<vmem>>, vector<1x16x64xf32>,
    %122 = vector.extract_strided_slice %1 {offsets = [0, 30], sizes = [16, 64], strides = [1, 1]} : vector<16x95xf32> to vector<16x64xf32>
    %c0_64 = arith.constant 0 : index
    %c480 = arith.constant 480 : index
    %c0_65 = arith.constant 0 : index
    %123 = vector.load %arg5[%c0_64, %c480, %c0_65] : memref<2x512x64xf32, #tpu.memory_space<vmem>>, vector<1x16x64xf32>
    %124 = vector.shape_cast %123 : vector<1x16x64xf32> to vector<16x64xf32>
    %125 = vector.shape_cast %122 : vector<16x64xf32> to vector<1x16x64xf32>
    tpu.vector_store %arg5[%c0_64, %c480, %c0_65], %125 {strides = array<i32>} : memref<2x512x64xf32, #tpu.memory_space<vmem>>, vector<1x16x64xf32>,
    %126 = vector.extract_strided_slice %1 {offsets = [0, 31], sizes = [16, 64], strides = [1, 1]} : vector<16x95xf32> to vector<16x64xf32>
    %c0_66 = arith.constant 0 : index
    %c496 = arith.constant 496 : index
    %c0_67 = arith.constant 0 : index
    %127 = vector.load %arg5[%c0_66, %c496, %c0_67] : memref<2x512x64xf32, #tpu.memory_space<vmem>>, vector<1x16x64xf32>
    %128 = vector.shape_cast %127 : vector<1x16x64xf32> to vector<16x64xf32>
    %129 = vector.shape_cast %126 : vector<16x64xf32> to vector<1x16x64xf32>
    tpu.vector_store %arg5[%c0_66, %c496, %c0_67], %129 {strides = array<i32>} : memref<2x512x64xf32, #tpu.memory_space<vmem>>, vector<1x16x64xf32>,
    %c0_68 = arith.constant 0 : index
    %c1 = arith.constant 1 : index
    %c0_69 = arith.constant 0 : index
    %c0_70 = arith.constant 0 : index
    %130 = vector.load %arg1[%c0_68, %c1, %c0_69, %c0_70] : memref<1x2x16x95xf32, #tpu.memory_space<vmem>>, vector<1x1x16x95xf32>
    %131 = vector.shape_cast %130 : vector<1x1x16x95xf32> to vector<16x95xf32>
    %132 = vector.extract_strided_slice %131 {offsets = [0, 0], sizes = [16, 64], strides = [1, 1]} : vector<16x95xf32> to vector<16x64xf32>
    %c1_71 = arith.constant 1 : index
    %c0_72 = arith.constant 0 : index
    %c0_73 = arith.constant 0 : index
    %133 = vector.load %arg5[%c1_71, %c0_72, %c0_73] : memref<2x512x64xf32, #tpu.memory_space<vmem>>, vector<1x16x64xf32>
    %134 = vector.shape_cast %133 : vector<1x16x64xf32> to vector<16x64xf32>
    %135 = vector.shape_cast %132 : vector<16x64xf32> to vector<1x16x64xf32>
    tpu.vector_store %arg5[%c1_71, %c0_72, %c0_73], %135 {strides = array<i32>} : memref<2x512x64xf32, #tpu.memory_space<vmem>>, vector<1x16x64xf32>,
    %136 = vector.extract_strided_slice %131 {offsets = [0, 1], sizes = [16, 64], strides = [1, 1]} : vector<16x95xf32> to vector<16x64xf32>
    %c1_74 = arith.constant 1 : index
    %c16_75 = arith.constant 16 : index
    %c0_76 = arith.constant 0 : index
    %137 = vector.load %arg5[%c1_74, %c16_75, %c0_76] : memref<2x512x64xf32, #tpu.memory_space<vmem>>, vector<1x16x64xf32>
    %138 = vector.shape_cast %137 : vector<1x16x64xf32> to vector<16x64xf32>
    %139 = vector.shape_cast %136 : vector<16x64xf32> to vector<1x16x64xf32>
    tpu.vector_store %arg5[%c1_74, %c16_75, %c0_76], %139 {strides = array<i32>} : memref<2x512x64xf32, #tpu.memory_space<vmem>>, vector<1x16x64xf32>,
    %140 = vector.extract_strided_slice %131 {offsets = [0, 2], sizes = [16, 64], strides = [1, 1]} : vector<16x95xf32> to vector<16x64xf32>
    %c1_77 = arith.constant 1 : index
    %c32_78 = arith.constant 32 : index
    %c0_79 = arith.constant 0 : index
    %141 = vector.load %arg5[%c1_77, %c32_78, %c0_79] : memref<2x512x64xf32, #tpu.memory_space<vmem>>, vector<1x16x64xf32>
    %142 = vector.shape_cast %141 : vector<1x16x64xf32> to vector<16x64xf32>
    %143 = vector.shape_cast %140 : vector<16x64xf32> to vector<1x16x64xf32>
    tpu.vector_store %arg5[%c1_77, %c32_78, %c0_79], %143 {strides = array<i32>} : memref<2x512x64xf32, #tpu.memory_space<vmem>>, vector<1x16x64xf32>,
    %144 = vector.extract_strided_slice %131 {offsets = [0, 3], sizes = [16, 64], strides = [1, 1]} : vector<16x95xf32> to vector<16x64xf32>
    %c1_80 = arith.constant 1 : index
    %c48_81 = arith.constant 48 : index
    %c0_82 = arith.constant 0 : index
    %145 = vector.load %arg5[%c1_80, %c48_81, %c0_82] : memref<2x512x64xf32, #tpu.memory_space<vmem>>, vector<1x16x64xf32>
    %146 = vector.shape_cast %145 : vector<1x16x64xf32> to vector<16x64xf32>
    %147 = vector.shape_cast %144 : vector<16x64xf32> to vector<1x16x64xf32>
    tpu.vector_store %arg5[%c1_80, %c48_81, %c0_82], %147 {strides = array<i32>} : memref<2x512x64xf32, #tpu.memory_space<vmem>>, vector<1x16x64xf32>,
    %148 = vector.extract_strided_slice %131 {offsets = [0, 4], sizes = [16, 64], strides = [1, 1]} : vector<16x95xf32> to vector<16x64xf32>
    %c1_83 = arith.constant 1 : index
    %c64_84 = arith.constant 64 : index
    %c0_85 = arith.constant 0 : index
    %149 = vector.load %arg5[%c1_83, %c64_84, %c0_85] : memref<2x512x64xf32, #tpu.memory_space<vmem>>, vector<1x16x64xf32>
    %150 = vector.shape_cast %149 : vector<1x16x64xf32> to vector<16x64xf32>
    %151 = vector.shape_cast %148 : vector<16x64xf32> to vector<1x16x64xf32>
    tpu.vector_store %arg5[%c1_83, %c64_84, %c0_85], %151 {strides = array<i32>} : memref<2x512x64xf32, #tpu.memory_space<vmem>>, vector<1x16x64xf32>,
    %152 = vector.extract_strided_slice %131 {offsets = [0, 5], sizes = [16, 64], strides = [1, 1]} : vector<16x95xf32> to vector<16x64xf32>
    %c1_86 = arith.constant 1 : index
    %c80_87 = arith.constant 80 : index
    %c0_88 = arith.constant 0 : index
    %153 = vector.load %arg5[%c1_86, %c80_87, %c0_88] : memref<2x512x64xf32, #tpu.memory_space<vmem>>, vector<1x16x64xf32>
    %154 = vector.shape_cast %153 : vector<1x16x64xf32> to vector<16x64xf32>
    %155 = vector.shape_cast %152 : vector<16x64xf32> to vector<1x16x64xf32>
    tpu.vector_store %arg5[%c1_86, %c80_87, %c0_88], %155 {strides = array<i32>} : memref<2x512x64xf32, #tpu.memory_space<vmem>>, vector<1x16x64xf32>,
    %156 = vector.extract_strided_slice %131 {offsets = [0, 6], sizes = [16, 64], strides = [1, 1]} : vector<16x95xf32> to vector<16x64xf32>
    %c1_89 = arith.constant 1 : index
    %c96_90 = arith.constant 96 : index
    %c0_91 = arith.constant 0 : index
    %157 = vector.load %arg5[%c1_89, %c96_90, %c0_91] : memref<2x512x64xf32, #tpu.memory_space<vmem>>, vector<1x16x64xf32>
    %158 = vector.shape_cast %157 : vector<1x16x64xf32> to vector<16x64xf32>
    %159 = vector.shape_cast %156 : vector<16x64xf32> to vector<1x16x64xf32>
    tpu.vector_store %arg5[%c1_89, %c96_90, %c0_91], %159 {strides = array<i32>} : memref<2x512x64xf32, #tpu.memory_space<vmem>>, vector<1x16x64xf32>,
    %160 = vector.extract_strided_slice %131 {offsets = [0, 7], sizes = [16, 64], strides = [1, 1]} : vector<16x95xf32> to vector<16x64xf32>
    %c1_92 = arith.constant 1 : index
    %c112_93 = arith.constant 112 : index
    %c0_94 = arith.constant 0 : index
    %161 = vector.load %arg5[%c1_92, %c112_93, %c0_94] : memref<2x512x64xf32, #tpu.memory_space<vmem>>, vector<1x16x64xf32>
    %162 = vector.shape_cast %161 : vector<1x16x64xf32> to vector<16x64xf32>
    %163 = vector.shape_cast %160 : vector<16x64xf32> to vector<1x16x64xf32>
    tpu.vector_store %arg5[%c1_92, %c112_93, %c0_94], %163 {strides = array<i32>} : memref<2x512x64xf32, #tpu.memory_space<vmem>>, vector<1x16x64xf32>,
    %164 = vector.extract_strided_slice %131 {offsets = [0, 8], sizes = [16, 64], strides = [1, 1]} : vector<16x95xf32> to vector<16x64xf32>
    %c1_95 = arith.constant 1 : index
    %c128_96 = arith.constant 128 : index
    %c0_97 = arith.constant 0 : index
    %165 = vector.load %arg5[%c1_95, %c128_96, %c0_97] : memref<2x512x64xf32, #tpu.memory_space<vmem>>, vector<1x16x64xf32>
    %166 = vector.shape_cast %165 : vector<1x16x64xf32> to vector<16x64xf32>
    %167 = vector.shape_cast %164 : vector<16x64xf32> to vector<1x16x64xf32>
    tpu.vector_store %arg5[%c1_95, %c128_96, %c0_97], %167 {strides = array<i32>} : memref<2x512x64xf32, #tpu.memory_space<vmem>>, vector<1x16x64xf32>,
    %168 = vector.extract_strided_slice %131 {offsets = [0, 9], sizes = [16, 64], strides = [1, 1]} : vector<16x95xf32> to vector<16x64xf32>
    %c1_98 = arith.constant 1 : index
    %c144_99 = arith.constant 144 : index
    %c0_100 = arith.constant 0 : index
    %169 = vector.load %arg5[%c1_98, %c144_99, %c0_100] : memref<2x512x64xf32, #tpu.memory_space<vmem>>, vector<1x16x64xf32>
    %170 = vector.shape_cast %169 : vector<1x16x64xf32> to vector<16x64xf32>
    %171 = vector.shape_cast %168 : vector<16x64xf32> to vector<1x16x64xf32>
    tpu.vector_store %arg5[%c1_98, %c144_99, %c0_100], %171 {strides = array<i32>} : memref<2x512x64xf32, #tpu.memory_space<vmem>>, vector<1x16x64xf32>,
    %172 = vector.extract_strided_slice %131 {offsets = [0, 10], sizes = [16, 64], strides = [1, 1]} : vector<16x95xf32> to vector<16x64xf32>
    %c1_101 = arith.constant 1 : index
    %c160_102 = arith.constant 160 : index
    %c0_103 = arith.constant 0 : index
    %173 = vector.load %arg5[%c1_101, %c160_102, %c0_103] : memref<2x512x64xf32, #tpu.memory_space<vmem>>, vector<1x16x64xf32>
    %174 = vector.shape_cast %173 : vector<1x16x64xf32> to vector<16x64xf32>
    %175 = vector.shape_cast %172 : vector<16x64xf32> to vector<1x16x64xf32>
    tpu.vector_store %arg5[%c1_101, %c160_102, %c0_103], %175 {strides = array<i32>} : memref<2x512x64xf32, #tpu.memory_space<vmem>>, vector<1x16x64xf32>,
    %176 = vector.extract_strided_slice %131 {offsets = [0, 11], sizes = [16, 64], strides = [1, 1]} : vector<16x95xf32> to vector<16x64xf32>
    %c1_104 = arith.constant 1 : index
    %c176_105 = arith.constant 176 : index
    %c0_106 = arith.constant 0 : index
    %177 = vector.load %arg5[%c1_104, %c176_105, %c0_106] : memref<2x512x64xf32, #tpu.memory_space<vmem>>, vector<1x16x64xf32>
    %178 = vector.shape_cast %177 : vector<1x16x64xf32> to vector<16x64xf32>
    %179 = vector.shape_cast %176 : vector<16x64xf32> to vector<1x16x64xf32>
    tpu.vector_store %arg5[%c1_104, %c176_105, %c0_106], %179 {strides = array<i32>} : memref<2x512x64xf32, #tpu.memory_space<vmem>>, vector<1x16x64xf32>,
    %180 = vector.extract_strided_slice %131 {offsets = [0, 12], sizes = [16, 64], strides = [1, 1]} : vector<16x95xf32> to vector<16x64xf32>
    %c1_107 = arith.constant 1 : index
    %c192_108 = arith.constant 192 : index
    %c0_109 = arith.constant 0 : index
    %181 = vector.load %arg5[%c1_107, %c192_108, %c0_109] : memref<2x512x64xf32, #tpu.memory_space<vmem>>, vector<1x16x64xf32>
    %182 = vector.shape_cast %181 : vector<1x16x64xf32> to vector<16x64xf32>
    %183 = vector.shape_cast %180 : vector<16x64xf32> to vector<1x16x64xf32>
    tpu.vector_store %arg5[%c1_107, %c192_108, %c0_109], %183 {strides = array<i32>} : memref<2x512x64xf32, #tpu.memory_space<vmem>>, vector<1x16x64xf32>,
    %184 = vector.extract_strided_slice %131 {offsets = [0, 13], sizes = [16, 64], strides = [1, 1]} : vector<16x95xf32> to vector<16x64xf32>
    %c1_110 = arith.constant 1 : index
    %c208_111 = arith.constant 208 : index
    %c0_112 = arith.constant 0 : index
    %185 = vector.load %arg5[%c1_110, %c208_111, %c0_112] : memref<2x512x64xf32, #tpu.memory_space<vmem>>, vector<1x16x64xf32>
    %186 = vector.shape_cast %185 : vector<1x16x64xf32> to vector<16x64xf32>
    %187 = vector.shape_cast %184 : vector<16x64xf32> to vector<1x16x64xf32>
    tpu.vector_store %arg5[%c1_110, %c208_111, %c0_112], %187 {strides = array<i32>} : memref<2x512x64xf32, #tpu.memory_space<vmem>>, vector<1x16x64xf32>,
    %188 = vector.extract_strided_slice %131 {offsets = [0, 14], sizes = [16, 64], strides = [1, 1]} : vector<16x95xf32> to vector<16x64xf32>
    %c1_113 = arith.constant 1 : index
    %c224_114 = arith.constant 224 : index
    %c0_115 = arith.constant 0 : index
    %189 = vector.load %arg5[%c1_113, %c224_114, %c0_115] : memref<2x512x64xf32, #tpu.memory_space<vmem>>, vector<1x16x64xf32>
    %190 = vector.shape_cast %189 : vector<1x16x64xf32> to vector<16x64xf32>
    %191 = vector.shape_cast %188 : vector<16x64xf32> to vector<1x16x64xf32>
    tpu.vector_store %arg5[%c1_113, %c224_114, %c0_115], %191 {strides = array<i32>} : memref<2x512x64xf32, #tpu.memory_space<vmem>>, vector<1x16x64xf32>,
    %192 = vector.extract_strided_slice %131 {offsets = [0, 15], sizes = [16, 64], strides = [1, 1]} : vector<16x95xf32> to vector<16x64xf32>
    %c1_116 = arith.constant 1 : index
    %c240_117 = arith.constant 240 : index
    %c0_118 = arith.constant 0 : index
    %193 = vector.load %arg5[%c1_116, %c240_117, %c0_118] : memref<2x512x64xf32, #tpu.memory_space<vmem>>, vector<1x16x64xf32>
    %194 = vector.shape_cast %193 : vector<1x16x64xf32> to vector<16x64xf32>
    %195 = vector.shape_cast %192 : vector<16x64xf32> to vector<1x16x64xf32>
    tpu.vector_store %arg5[%c1_116, %c240_117, %c0_118], %195 {strides = array<i32>} : memref<2x512x64xf32, #tpu.memory_space<vmem>>, vector<1x16x64xf32>,
    %196 = vector.extract_strided_slice %131 {offsets = [0, 16], sizes = [16, 64], strides = [1, 1]} : vector<16x95xf32> to vector<16x64xf32>
    %c1_119 = arith.constant 1 : index
    %c256_120 = arith.constant 256 : index
    %c0_121 = arith.constant 0 : index
    %197 = vector.load %arg5[%c1_119, %c256_120, %c0_121] : memref<2x512x64xf32, #tpu.memory_space<vmem>>, vector<1x16x64xf32>
    %198 = vector.shape_cast %197 : vector<1x16x64xf32> to vector<16x64xf32>
    %199 = vector.shape_cast %196 : vector<16x64xf32> to vector<1x16x64xf32>
    tpu.vector_store %arg5[%c1_119, %c256_120, %c0_121], %199 {strides = array<i32>} : memref<2x512x64xf32, #tpu.memory_space<vmem>>, vector<1x16x64xf32>,
    %200 = vector.extract_strided_slice %131 {offsets = [0, 17], sizes = [16, 64], strides = [1, 1]} : vector<16x95xf32> to vector<16x64xf32>
    %c1_122 = arith.constant 1 : index
    %c272_123 = arith.constant 272 : index
    %c0_124 = arith.constant 0 : index
    %201 = vector.load %arg5[%c1_122, %c272_123, %c0_124] : memref<2x512x64xf32, #tpu.memory_space<vmem>>, vector<1x16x64xf32>
    %202 = vector.shape_cast %201 : vector<1x16x64xf32> to vector<16x64xf32>
    %203 = vector.shape_cast %200 : vector<16x64xf32> to vector<1x16x64xf32>
    tpu.vector_store %arg5[%c1_122, %c272_123, %c0_124], %203 {strides = array<i32>} : memref<2x512x64xf32, #tpu.memory_space<vmem>>, vector<1x16x64xf32>,
    %204 = vector.extract_strided_slice %131 {offsets = [0, 18], sizes = [16, 64], strides = [1, 1]} : vector<16x95xf32> to vector<16x64xf32>
    %c1_125 = arith.constant 1 : index
    %c288_126 = arith.constant 288 : index
    %c0_127 = arith.constant 0 : index
    %205 = vector.load %arg5[%c1_125, %c288_126, %c0_127] : memref<2x512x64xf32, #tpu.memory_space<vmem>>, vector<1x16x64xf32>
    %206 = vector.shape_cast %205 : vector<1x16x64xf32> to vector<16x64xf32>
    %207 = vector.shape_cast %204 : vector<16x64xf32> to vector<1x16x64xf32>
    tpu.vector_store %arg5[%c1_125, %c288_126, %c0_127], %207 {strides = array<i32>} : memref<2x512x64xf32, #tpu.memory_space<vmem>>, vector<1x16x64xf32>,
    %208 = vector.extract_strided_slice %131 {offsets = [0, 19], sizes = [16, 64], strides = [1, 1]} : vector<16x95xf32> to vector<16x64xf32>
    %c1_128 = arith.constant 1 : index
    %c304_129 = arith.constant 304 : index
    %c0_130 = arith.constant 0 : index
    %209 = vector.load %arg5[%c1_128, %c304_129, %c0_130] : memref<2x512x64xf32, #tpu.memory_space<vmem>>, vector<1x16x64xf32>
    %210 = vector.shape_cast %209 : vector<1x16x64xf32> to vector<16x64xf32>
    %211 = vector.shape_cast %208 : vector<16x64xf32> to vector<1x16x64xf32>
    tpu.vector_store %arg5[%c1_128, %c304_129, %c0_130], %211 {strides = array<i32>} : memref<2x512x64xf32, #tpu.memory_space<vmem>>, vector<1x16x64xf32>,
    %212 = vector.extract_strided_slice %131 {offsets = [0, 20], sizes = [16, 64], strides = [1, 1]} : vector<16x95xf32> to vector<16x64xf32>
    %c1_131 = arith.constant 1 : index
    %c320_132 = arith.constant 320 : index
    %c0_133 = arith.constant 0 : index
    %213 = vector.load %arg5[%c1_131, %c320_132, %c0_133] : memref<2x512x64xf32, #tpu.memory_space<vmem>>, vector<1x16x64xf32>
    %214 = vector.shape_cast %213 : vector<1x16x64xf32> to vector<16x64xf32>
    %215 = vector.shape_cast %212 : vector<16x64xf32> to vector<1x16x64xf32>
    tpu.vector_store %arg5[%c1_131, %c320_132, %c0_133], %215 {strides = array<i32>} : memref<2x512x64xf32, #tpu.memory_space<vmem>>, vector<1x16x64xf32>,
    %216 = vector.extract_strided_slice %131 {offsets = [0, 21], sizes = [16, 64], strides = [1, 1]} : vector<16x95xf32> to vector<16x64xf32>
    %c1_134 = arith.constant 1 : index
    %c336_135 = arith.constant 336 : index
    %c0_136 = arith.constant 0 : index
    %217 = vector.load %arg5[%c1_134, %c336_135, %c0_136] : memref<2x512x64xf32, #tpu.memory_space<vmem>>, vector<1x16x64xf32>
    %218 = vector.shape_cast %217 : vector<1x16x64xf32> to vector<16x64xf32>
    %219 = vector.shape_cast %216 : vector<16x64xf32> to vector<1x16x64xf32>
    tpu.vector_store %arg5[%c1_134, %c336_135, %c0_136], %219 {strides = array<i32>} : memref<2x512x64xf32, #tpu.memory_space<vmem>>, vector<1x16x64xf32>,
    %220 = vector.extract_strided_slice %131 {offsets = [0, 22], sizes = [16, 64], strides = [1, 1]} : vector<16x95xf32> to vector<16x64xf32>
    %c1_137 = arith.constant 1 : index
    %c352_138 = arith.constant 352 : index
    %c0_139 = arith.constant 0 : index
    %221 = vector.load %arg5[%c1_137, %c352_138, %c0_139] : memref<2x512x64xf32, #tpu.memory_space<vmem>>, vector<1x16x64xf32>
    %222 = vector.shape_cast %221 : vector<1x16x64xf32> to vector<16x64xf32>
    %223 = vector.shape_cast %220 : vector<16x64xf32> to vector<1x16x64xf32>
    tpu.vector_store %arg5[%c1_137, %c352_138, %c0_139], %223 {strides = array<i32>} : memref<2x512x64xf32, #tpu.memory_space<vmem>>, vector<1x16x64xf32>,
    %224 = vector.extract_strided_slice %131 {offsets = [0, 23], sizes = [16, 64], strides = [1, 1]} : vector<16x95xf32> to vector<16x64xf32>
    %c1_140 = arith.constant 1 : index
    %c368_141 = arith.constant 368 : index
    %c0_142 = arith.constant 0 : index
    %225 = vector.load %arg5[%c1_140, %c368_141, %c0_142] : memref<2x512x64xf32, #tpu.memory_space<vmem>>, vector<1x16x64xf32>
    %226 = vector.shape_cast %225 : vector<1x16x64xf32> to vector<16x64xf32>
    %227 = vector.shape_cast %224 : vector<16x64xf32> to vector<1x16x64xf32>
    tpu.vector_store %arg5[%c1_140, %c368_141, %c0_142], %227 {strides = array<i32>} : memref<2x512x64xf32, #tpu.memory_space<vmem>>, vector<1x16x64xf32>,
    %228 = vector.extract_strided_slice %131 {offsets = [0, 24], sizes = [16, 64], strides = [1, 1]} : vector<16x95xf32> to vector<16x64xf32>
    %c1_143 = arith.constant 1 : index
    %c384_144 = arith.constant 384 : index
    %c0_145 = arith.constant 0 : index
    %229 = vector.load %arg5[%c1_143, %c384_144, %c0_145] : memref<2x512x64xf32, #tpu.memory_space<vmem>>, vector<1x16x64xf32>
    %230 = vector.shape_cast %229 : vector<1x16x64xf32> to vector<16x64xf32>
    %231 = vector.shape_cast %228 : vector<16x64xf32> to vector<1x16x64xf32>
    tpu.vector_store %arg5[%c1_143, %c384_144, %c0_145], %231 {strides = array<i32>} : memref<2x512x64xf32, #tpu.memory_space<vmem>>, vector<1x16x64xf32>,
    %232 = vector.extract_strided_slice %131 {offsets = [0, 25], sizes = [16, 64], strides = [1, 1]} : vector<16x95xf32> to vector<16x64xf32>
    %c1_146 = arith.constant 1 : index
    %c400_147 = arith.constant 400 : index
    %c0_148 = arith.constant 0 : index
    %233 = vector.load %arg5[%c1_146, %c400_147, %c0_148] : memref<2x512x64xf32, #tpu.memory_space<vmem>>, vector<1x16x64xf32>
    %234 = vector.shape_cast %233 : vector<1x16x64xf32> to vector<16x64xf32>
    %235 = vector.shape_cast %232 : vector<16x64xf32> to vector<1x16x64xf32>
    tpu.vector_store %arg5[%c1_146, %c400_147, %c0_148], %235 {strides = array<i32>} : memref<2x512x64xf32, #tpu.memory_space<vmem>>, vector<1x16x64xf32>,
    %236 = vector.extract_strided_slice %131 {offsets = [0, 26], sizes = [16, 64], strides = [1, 1]} : vector<16x95xf32> to vector<16x64xf32>
    %c1_149 = arith.constant 1 : index
    %c416_150 = arith.constant 416 : index
    %c0_151 = arith.constant 0 : index
    %237 = vector.load %arg5[%c1_149, %c416_150, %c0_151] : memref<2x512x64xf32, #tpu.memory_space<vmem>>, vector<1x16x64xf32>
    %238 = vector.shape_cast %237 : vector<1x16x64xf32> to vector<16x64xf32>
    %239 = vector.shape_cast %236 : vector<16x64xf32> to vector<1x16x64xf32>
    tpu.vector_store %arg5[%c1_149, %c416_150, %c0_151], %239 {strides = array<i32>} : memref<2x512x64xf32, #tpu.memory_space<vmem>>, vector<1x16x64xf32>,
    %240 = vector.extract_strided_slice %131 {offsets = [0, 27], sizes = [16, 64], strides = [1, 1]} : vector<16x95xf32> to vector<16x64xf32>
    %c1_152 = arith.constant 1 : index
    %c432_153 = arith.constant 432 : index
    %c0_154 = arith.constant 0 : index
    %241 = vector.load %arg5[%c1_152, %c432_153, %c0_154] : memref<2x512x64xf32, #tpu.memory_space<vmem>>, vector<1x16x64xf32>
    %242 = vector.shape_cast %241 : vector<1x16x64xf32> to vector<16x64xf32>
    %243 = vector.shape_cast %240 : vector<16x64xf32> to vector<1x16x64xf32>
    tpu.vector_store %arg5[%c1_152, %c432_153, %c0_154], %243 {strides = array<i32>} : memref<2x512x64xf32, #tpu.memory_space<vmem>>, vector<1x16x64xf32>,
    %244 = vector.extract_strided_slice %131 {offsets = [0, 28], sizes = [16, 64], strides = [1, 1]} : vector<16x95xf32> to vector<16x64xf32>
    %c1_155 = arith.constant 1 : index
    %c448_156 = arith.constant 448 : index
    %c0_157 = arith.constant 0 : index
    %245 = vector.load %arg5[%c1_155, %c448_156, %c0_157] : memref<2x512x64xf32, #tpu.memory_space<vmem>>, vector<1x16x64xf32>
    %246 = vector.shape_cast %245 : vector<1x16x64xf32> to vector<16x64xf32>
    %247 = vector.shape_cast %244 : vector<16x64xf32> to vector<1x16x64xf32>
    tpu.vector_store %arg5[%c1_155, %c448_156, %c0_157], %247 {strides = array<i32>} : memref<2x512x64xf32, #tpu.memory_space<vmem>>, vector<1x16x64xf32>,
    %248 = vector.extract_strided_slice %131 {offsets = [0, 29], sizes = [16, 64], strides = [1, 1]} : vector<16x95xf32> to vector<16x64xf32>
    %c1_158 = arith.constant 1 : index
    %c464_159 = arith.constant 464 : index
    %c0_160 = arith.constant 0 : index
    %249 = vector.load %arg5[%c1_158, %c464_159, %c0_160] : memref<2x512x64xf32, #tpu.memory_space<vmem>>, vector<1x16x64xf32>
    %250 = vector.shape_cast %249 : vector<1x16x64xf32> to vector<16x64xf32>
    %251 = vector.shape_cast %248 : vector<16x64xf32> to vector<1x16x64xf32>
    tpu.vector_store %arg5[%c1_158, %c464_159, %c0_160], %251 {strides = array<i32>} : memref<2x512x64xf32, #tpu.memory_space<vmem>>, vector<1x16x64xf32>,
    %252 = vector.extract_strided_slice %131 {offsets = [0, 30], sizes = [16, 64], strides = [1, 1]} : vector<16x95xf32> to vector<16x64xf32>
    %c1_161 = arith.constant 1 : index
    %c480_162 = arith.constant 480 : index
    %c0_163 = arith.constant 0 : index
    %253 = vector.load %arg5[%c1_161, %c480_162, %c0_163] : memref<2x512x64xf32, #tpu.memory_space<vmem>>, vector<1x16x64xf32>
    %254 = vector.shape_cast %253 : vector<1x16x64xf32> to vector<16x64xf32>
    %255 = vector.shape_cast %252 : vector<16x64xf32> to vector<1x16x64xf32>
    tpu.vector_store %arg5[%c1_161, %c480_162, %c0_163], %255 {strides = array<i32>} : memref<2x512x64xf32, #tpu.memory_space<vmem>>, vector<1x16x64xf32>,
    %256 = vector.extract_strided_slice %131 {offsets = [0, 31], sizes = [16, 64], strides = [1, 1]} : vector<16x95xf32> to vector<16x64xf32>
    %c1_164 = arith.constant 1 : index
    %c496_165 = arith.constant 496 : index
    %c0_166 = arith.constant 0 : index
    %257 = vector.load %arg5[%c1_164, %c496_165, %c0_166] : memref<2x512x64xf32, #tpu.memory_space<vmem>>, vector<1x16x64xf32>
    %258 = vector.shape_cast %257 : vector<1x16x64xf32> to vector<16x64xf32>
    %259 = vector.shape_cast %256 : vector<16x64xf32> to vector<1x16x64xf32>
    tpu.vector_store %arg5[%c1_164, %c496_165, %c0_166], %259 {strides = array<i32>} : memref<2x512x64xf32, #tpu.memory_space<vmem>>, vector<1x16x64xf32>,
    %c0_167 = arith.constant 0 : index
    %c0_168 = arith.constant 0 : index
    %260 = vector.load %arg3[%c0_167, %c0_168] : memref<16x1xf32, #tpu.memory_space<vmem>>, vector<16x1xf32>
    %261 = vector.shape_cast %260 : vector<16x1xf32> to vector<16x1xf32>
    %262 = vector.broadcast %261 : vector<16x1xf32> to vector<16x64xf32>
    %c0_169 = arith.constant 0 : index
    %c0_170 = arith.constant 0 : index
    %c0_171 = arith.constant 0 : index
    %263 = vector.load %arg2[%c0_169, %c0_170, %c0_171] : memref<2x16x512xf32, #tpu.memory_space<vmem>>, vector<1x16x512xf32>
    %264 = vector.shape_cast %263 : vector<1x16x512xf32> to vector<16x512xf32>
    %c0_172 = arith.constant 0 : index
    %c0_173 = arith.constant 0 : index
    %c0_174 = arith.constant 0 : index
    %265 = vector.load %arg5[%c0_172, %c0_173, %c0_174] : memref<2x512x64xf32, #tpu.memory_space<vmem>>, vector<1x512x64xf32>
    %266 = vector.shape_cast %265 : vector<1x512x64xf32> to vector<512x64xf32>
    %cst = arith.constant dense<0.000000e+00> : vector<16x64xf32>
    %267 = tpu.matmul %264, %266, %cst {dimension_numbers = #tpu.dot_dimension_numbers<[1], [0], [0], [1], [0, 0, 1, 1], [], []>} : vector<16x512xf32>, vector<512x64xf32>, vector<16x64xf32> -> vector<16x64xf32>
    %268 = arith.addf %262, %267 : vector<16x64xf32>
    %c1_175 = arith.constant 1 : index
    %c0_176 = arith.constant 0 : index
    %c0_177 = arith.constant 0 : index
    %269 = vector.load %arg2[%c1_175, %c0_176, %c0_177] : memref<2x16x512xf32, #tpu.memory_space<vmem>>, vector<1x16x512xf32>
    %270 = vector.shape_cast %269 : vector<1x16x512xf32> to vector<16x512xf32>
    %c1_178 = arith.constant 1 : index
    %c0_179 = arith.constant 0 : index
    %c0_180 = arith.constant 0 : index
    %271 = vector.load %arg5[%c1_178, %c0_179, %c0_180] : memref<2x512x64xf32, #tpu.memory_space<vmem>>, vector<1x512x64xf32>
    %272 = vector.shape_cast %271 : vector<1x512x64xf32> to vector<512x64xf32>
    %cst_181 = arith.constant dense<0.000000e+00> : vector<16x64xf32>
    %273 = tpu.matmul %270, %272, %cst_181 {dimension_numbers = #tpu.dot_dimension_numbers<[1], [0], [0], [1], [0, 0, 1, 1], [], []>} : vector<16x512xf32>, vector<512x64xf32>, vector<16x64xf32> -> vector<16x64xf32>
    %274 = arith.addf %268, %273 : vector<16x64xf32>
    %cst_182 = arith.constant 0.000000e+00 : f32
    %275 = vector.broadcast %cst_182 : f32 to vector<16x64xf32>
    %276 = arith.maximumf %274, %275 : vector<16x64xf32>
    %c0_183 = arith.constant 0 : index
    %c0_184 = arith.constant 0 : index
    %c0_185 = arith.constant 0 : index
    %277 = vector.load %arg4[%c0_183, %c0_184, %c0_185] : memref<1x16x64xf32, #tpu.memory_space<vmem>>, vector<1x16x64xf32>
    %278 = vector.shape_cast %277 : vector<1x16x64xf32> to vector<16x64xf32>
    %279 = vector.shape_cast %276 : vector<16x64xf32> to vector<1x16x64xf32>
    tpu.vector_store %arg4[%c0_183, %c0_184, %c0_185], %279 {strides = array<i32>} : memref<1x16x64xf32, #tpu.memory_space<vmem>>, vector<1x16x64xf32>,
    return
  }
  func.func @transform_0(%arg0: i32) -> (i32, i32, i32, i32) {
    %c0_i32 = arith.constant 0 : i32
    %c0_i32_0 = arith.constant 0 : i32
    %c0_i32_1 = arith.constant 0 : i32
    %c0_i32_2 = arith.constant 0 : i32
    return %arg0, %c0_i32, %c0_i32_0, %c0_i32_1 : i32, i32, i32, i32
  }
  func.func @transform_1(%arg0: i32) -> (i32, i32, i32) {
    %c0_i32 = arith.constant 0 : i32
    %c0_i32_0 = arith.constant 0 : i32
    %c0_i32_1 = arith.constant 0 : i32
    %c0_i32_2 = arith.constant 0 : i32
    return %c0_i32, %c0_i32_0, %c0_i32_1 : i32, i32, i32
  }
  func.func @transform_2(%arg0: i32) -> (i32, i32) {
    %c0_i32 = arith.constant 0 : i32
    %c0_i32_0 = arith.constant 0 : i32
    %c0_i32_1 = arith.constant 0 : i32
    return %c0_i32, %c0_i32_0 : i32, i32
  }
  func.func @transform_3(%arg0: i32) -> (i32, i32, i32) {
    %c0_i32 = arith.constant 0 : i32
    %c0_i32_0 = arith.constant 0 : i32
    %c0_i32_1 = arith.constant 0 : i32
    return %arg0, %c0_i32, %c0_i32_0 : i32, i32, i32
  }
}

</mosaic_0001>

<bundles_post_ra>
// kernel: feature_block1.1
= control target key start
LH: loop header
LB: loop body
LE: loop exit
PB: predicated region body
PF: predicated region fallthrough
CT: control target
= control target key end

     0   :  { %8 = vsyncpa [#allocation4], 0  ;;  %s2135_s0 = inlined_call_operand.vmem [shape: f32[2,2,16,95], index: 0, kind: input, shape index: {}]   ;;  %s2136_s1 = inlined_call_operand.vmem [shape: f32[2,16,512], index: 1, kind: input, shape index: {}]   ;;  %s2137_s2 = inlined_call_operand.vmem [shape: f32[16,1], index: 2, kind: input, shape index: {}]   ;;  %s2138_s3 = inlined_call_operand.hbm [shape: f32[2,16,64], index: 3, kind: output, shape index: {}]  }
   0x1   :  { %10 = vsyncpa [#allocation4 + $0x1], 0  ;;  %s1589_s12 = smov 0   ;;  %s1591_s13 = smov 0  }
   0x2   :  { %s1593_s14 = smov 0   ;;  %s1595_s15 = smov 0  }
   0x3 LB: > { %s1610_s16 = sadd.s32 4294967295, %s1532_s15   ;;  %s1221_s17 = sadd.s32 4294967294, %s1532_s15   ;;  %s1532_s15 = sphi %s1595_s15, %s2195_s15   ;;  %s1528_s14 = sphi %s1593_s14, %s2194_s14   ;;  %s1524_s13 = sphi %s1591_s13, %s2193_s13   ;;  %s1520_s12 = sphi %s1589_s12, %s2192_s12  }
   0x4   : > { %s1614_s18 = sadd.s32 1, %s1532_s15   ;;  %s91_s19 = sadd.s32 1, %s1528_s14 }
   0x5   : > { %s88_s20 = ssub.s32 %s1532_s15, %s1614_s18  ;;  %p101_p0 = scmp.ne.s32.totalorder %s1528_s14, %s1524_s13 }
   0x6   : > { %p89_p1 = scmp.eq.s32.totalorder %s88_s20, 0  ;;  %p102_p2 = scmp.eq.s32.totalorder %s1610_s16, 1 }
   0x7   : > { %p107_p3 = scmp.ne.s32.totalorder %s1524_s13, %s1520_s12  ;;  %p108_p4 = scmp.eq.s32.totalorder %s1221_s17, 1 }
   0x8   : > { %s1625_s21 = scalar_select %p89_p1, %s1528_s14, %s91_s19  }
   0x9   : > { %p1627_p5 = por %p102_p2, %p101_p0  ;;  %p1631_p6 = por %p108_p4, %p107_p3 }
   0xa   : > { %p1224_p7 = scmp.ge.s32.totalorder %s1532_s15, 1  ;;  %p140_p8 = scmp.lt.s32.totalorder %s1532_s15, 3 }
   0xc   : > { %p141_p9 = pnand %p1224_p7, %p140_p8 }
   0xd   : > { %p164_p10 = scmp.lt.s32.totalorder (!%p141_p9), %s1610_s16, 1  ;;  %s1534_s29 = smov (!%p141_p9), 113  }
   0xe   : > { %144 = sbr.rel (%p141_p9) target bundleno = 614 (0x266), region = 32  ;;  %s1535_s30 = smov (!%p141_p9), 121  }
   0xf   : > { %s1536_s4 = smov (!%p141_p9), 97   ;;  %s1537_s5 = smov (!%p141_p9), 105  }
  0x10   : > { %s1538_s6 = smov (!%p141_p9), 114   ;;  %s1539_s7 = smov (!%p141_p9), 98  }
  0x11   : > { %s1540_s8 = smov (!%p141_p9), 122   ;;  %s1541_s9 = smov (!%p141_p9), 106  }
  0x12   : > { %s1542_s10 = smov (!%p141_p9), 115   ;;  %s1543_s11 = smov (!%p141_p9), 99  }
  0x13   : > { %s165_s24 = scalar_select %p164_p10, %s1610_s16, 1  ;;  %vm171_vm0 = vcmask 523264   ;;  %v693_v8 = vld [vmem:[%s2136_s1 + $0x8] sm:$0xff]  ;;  %v695_v13 = vld [vmem:[%s2136_s1 + $0x18] sm:$0xff] }
  0x14   : > { %s1544_s17 = smov 123   ;;  %s2139_s19 = smov 107   ;;  %828 = vmatprep.mubr.f32.mxu0 %v693_v8  ;;  %903 = vmatprep.mubr.f32.mxu1 %v695_v13 }
  0x15   : > { %s1243_s25 = sshll.u32 %s165_s24, 5  ;;  %s2141_s20 = smov 116  }
  0x16   : > { %s168_s28 = scalar_lea.vmem %s2135_s0, %s1243_s25  ;;  %s2147_s24 = smov 100  }
  0x17   : > { %v1642_v0 = vld [vmem:[%s168_s28 + $0x8] sm:$0xff]  ;;  %v1644_v1 = vld [vmem:[%s168_s28] sm:$0xff]  ;;  %v1646_v2 = vld [vmem:[%s168_s28 + $0x18] sm:$0xff]  ;;  %s2145_s25 = smov 124   ;;  %s2143_s26 = smov 108  }
  0x18   : > { %290 = vrot.lane.b32.xlu0 %v1642_v0, %s1534_s29  ;;  %226 = vrot.lane.b32.xlu1 %v1642_v0, %s1535_s30  ;;  %172 = vst.msk [vmem:[#allocation2] sm:$0xff] %vm171_vm0, %v1644_v1  ;;  %173 = vst.msk [vmem:[#allocation2 + $0x8] sm:$0xff] %vm171_vm0, %v1642_v0  ;;  %v1658_v3 = vld [vmem:[%s168_s28 + $0x10] sm:$0xff]  ;;  %s2149_s27 = smov 117   ;;  %s2155_s28 = smov 101  }
  0x19   : > { %429 = vst.msk [vmem:[#allocation2 + $0x208] sm:$0xff] %vm171_vm0, %v1646_v2  ;;  %428 = vst.msk [vmem:[#allocation2 + $0x200] sm:$0xff] %vm171_vm0, %v1658_v3 }
  0x1c   : > { %418 = vrot.lane.b32.xlu0 %v1642_v0, %s1536_s4  ;;  %354 = vrot.lane.b32.xlu1 %v1642_v0, %s1537_s5 }
  0x20   : > { %288 = vrot.lane.b32.xlu0 %v1644_v1, %s1534_s29  ;;  %416 = vrot.lane.b32.xlu1 %v1644_v1, %s1536_s4 }
  0x24   : > { %224 = vrot.lane.b32.xlu0 %v1644_v1, %s1535_s30  ;;  %352 = vrot.lane.b32.xlu1 %v1644_v1, %s1537_s5 }
  0x28   : > { %282 = vrot.lane.b32.xlu0 %v1642_v0, %s1538_s6  ;;  %410 = vrot.lane.b32.xlu1 %v1642_v0, %s1539_s7 }
  0x2c   : > { %218 = vrot.lane.b32.xlu0 %v1642_v0, %s1540_s8  ;;  %346 = vrot.lane.b32.xlu1 %v1642_v0, %s1541_s9 }
  0x30   : > { %280 = vrot.lane.b32.xlu0 %v1644_v1, %s1538_s6  ;;  %408 = vrot.lane.b32.xlu1 %v1644_v1, %s1539_s7 }
  0x34   : > { %216 = vrot.lane.b32.xlu0 %v1644_v1, %s1540_s8  ;;  %344 = vrot.lane.b32.xlu1 %v1644_v1, %s1541_s9 }
  0x38   : > { %274 = vrot.lane.b32.xlu0 %v1642_v0, %s1542_s10  ;;  %402 = vrot.lane.b32.xlu1 %v1642_v0, %s1543_s11 }
  0x3c   : > { %210 = vrot.lane.b32.xlu0 %v1642_v0, %s1544_s17  ;;  %338 = vrot.lane.b32.xlu1 %v1642_v0, %s2139_s19 }
  0x40   : > { %272 = vrot.lane.b32.xlu0 %v1644_v1, %s1542_s10  ;;  %400 = vrot.lane.b32.xlu1 %v1644_v1, %s1543_s11 }
  0x44   : > { %208 = vrot.lane.b32.xlu0 %v1644_v1, %s1544_s17  ;;  %336 = vrot.lane.b32.xlu1 %v1644_v1, %s2139_s19  ;;  %s2153_s19 = smov 125  }
  0x48   : > { %266 = vrot.lane.b32.xlu0 %v1642_v0, %s2141_s20  ;;  %394 = vrot.lane.b32.xlu1 %v1642_v0, %s2147_s24 }
  0x4c   : > { %202 = vrot.lane.b32.xlu0 %v1642_v0, %s2145_s25  ;;  %330 = vrot.lane.b32.xlu1 %v1642_v0, %s2143_s26 }
  0x50   : > { %264 = vrot.lane.b32.xlu0 %v1644_v1, %s2141_s20  ;;  %392 = vrot.lane.b32.xlu1 %v1644_v1, %s2147_s24  ;;  %s2151_s20 = smov 109   ;;  %s2161_s24 = smov 126  }
  0x54   : > { %200 = vrot.lane.b32.xlu0 %v1644_v1, %s2145_s25  ;;  %328 = vrot.lane.b32.xlu1 %v1644_v1, %s2143_s26  ;;  %s2157_s26 = smov 118   ;;  %s1555_s25 = smov 102  }
  0x58   : > { %258 = vrot.lane.b32.xlu0 %v1642_v0, %s2149_s27  ;;  %386 = vrot.lane.b32.xlu1 %v1642_v0, %s2155_s28 }
  0x5c   : > { %194 = vrot.lane.b32.xlu0 %v1642_v0, %s2153_s19  ;;  %322 = vrot.lane.b32.xlu1 %v1642_v0, %s2151_s20 }
  0x60   : > { %256 = vrot.lane.b32.xlu0 %v1644_v1, %s2149_s27  ;;  %384 = vrot.lane.b32.xlu1 %v1644_v1, %s2155_s28  ;;  %s2159_s27 = smov 110   ;;  %s2167_s28 = smov 127  }
  0x64   : > { %192 = vrot.lane.b32.xlu0 %v1644_v1, %s2153_s19  ;;  %320 = vrot.lane.b32.xlu1 %v1644_v1, %s2151_s20  ;;  %s2171_s20 = smov 119   ;;  %s2163_s19 = smov 103  }
  0x68   : > { %250 = vrot.lane.b32.xlu0 %v1642_v0, %s2157_s26  ;;  %378 = vrot.lane.b32.xlu1 %v1642_v0, %s1555_s25 }
  0x6c   : > { %186 = vrot.lane.b32.xlu0 %v1642_v0, %s2161_s24  ;;  %314 = vrot.lane.b32.xlu1 %v1642_v0, %s2159_s27 }
  0x70   : > { %248 = vrot.lane.b32.xlu0 %v1644_v1, %s2157_s26  ;;  %376 = vrot.lane.b32.xlu1 %v1644_v1, %s1555_s25  ;;  %s2165_s26 = smov 111  }
  0x74   : > { %184 = vrot.lane.b32.xlu0 %v1644_v1, %s2161_s24  ;;  %312 = vrot.lane.b32.xlu1 %v1644_v1, %s2159_s27  ;;  %s2169_s27 = smov 120   ;;  %s1563_s24 = smov 104  }
  0x78   : > { %242 = vrot.lane.b32.xlu0 %v1642_v0, %s2171_s20  ;;  %370 = vrot.lane.b32.xlu1 %v1642_v0, %s2163_s19 }
  0x7c   : > { %178 = vrot.lane.b32.xlu0 %v1642_v0, %s2167_s28  ;;  %306 = vrot.lane.b32.xlu1 %v1642_v0, %s2165_s26 }
  0x80   : > { %240 = vrot.lane.b32.xlu0 %v1644_v1, %s2171_s20  ;;  %368 = vrot.lane.b32.xlu1 %v1644_v1, %s2163_s19  ;;  %s1564_s19 = smov 112   ;;  %s2186_s20 = smov 110  }
  0x84   : > { %176 = vrot.lane.b32.xlu0 %v1644_v1, %s2167_s28  ;;  %304 = vrot.lane.b32.xlu1 %v1644_v1, %s2165_s26  ;;  %s2188_s26 = smov 103   ;;  %s2190_s28 = smov 111  }
  0x88   : > { %234 = vrot.lane.b32.xlu0 %v1642_v0, %s2169_s27  ;;  %362 = vrot.lane.b32.xlu1 %v1642_v0, %s1563_s24 }
  0x8a   : > { %v291_v4 = vpop.permute.xlu0 %290  ;;  %v227_v5 = vpop.permute.xlu1 %226 }
  0x8b   : > { %295 = vst.msk [vmem:[#allocation2 + $0xf8] sm:$0xff] %vm171_vm0, %v291_v4  ;;  %231 = vst.msk [vmem:[#allocation2 + $0x78] sm:$0xff] %vm171_vm0, %v227_v5 }
  0x8c   : > { %298 = vrot.lane.b32.xlu0 %v1642_v0, %s1564_s19  ;;  %232 = vrot.lane.b32.xlu1 %v1644_v1, %s2169_s27  ;;  %s2189_s27 = smov 127  }
  0x8e   : > { %v419_v6 = vpop.permute.xlu0 %418  ;;  %v355_v7 = vpop.permute.xlu1 %354 }
  0x8f   : > { %423 = vst.msk [vmem:[#allocation2 + $0x1f8] sm:$0xff] %vm171_vm0, %v419_v6  ;;  %359 = vst.msk [vmem:[#allocation2 + $0x178] sm:$0xff] %vm171_vm0, %v355_v7 }
  0x90   : > { %360 = vrot.lane.b32.xlu0 %v1644_v1, %s1563_s24  ;;  %296 = vrot.lane.b32.xlu1 %v1644_v1, %s1564_s19 }
  0x92   : > { %v289_v9 = vpop.permute.xlu0 %288  ;;  %v731_v10 = vld [vmem:[#allocation2 + $0xf8] sm:$0xff]  ;;  %v417_v11 = vpop.permute.xlu1 %416 }
  0x93   : > { %v715_v12 = vld [vmem:[#allocation2 + $0x78] sm:$0xff]  ;;  %294 = vst.msk [vmem:[#allocation2 + $0xf0] sm:$0xff] %vm171_vm0, %v289_v9  ;;  %1245 = vmatprep.subr.mxu0 %v731_v10  ;;  %422 = vst.msk [vmem:[#allocation2 + $0x1f0] sm:$0xff] %vm171_vm0, %v417_v11 }
  0x94   : > { %1246 = vmatpush3.msra.mxu0 %v715_v12  ;;  %546 = vrot.lane.b32.xlu0 %v1646_v2, %s1534_s29 }
  0x95   : > { %674 = vrot.lane.b32.xlu1 %v1646_v2, %s1536_s4 }
  0x96   : > { %v225_v14 = vpop.permute.xlu0 %224  ;;  %v763_v15 = vld [vmem:[#allocation2 + $0x1f8] sm:$0xff]  ;;  %v353_v16 = vpop.permute.xlu1 %352 }
  0x97   : > { %v747_v17 = vld [vmem:[#allocation2 + $0x178] sm:$0xff]  ;;  %230 = vst.msk [vmem:[#allocation2 + $0x70] sm:$0xff] %vm171_vm0, %v225_v14  ;;  %1283 = vmatprep.subr.mxu1 %v763_v15  ;;  %358 = vst.msk [vmem:[#allocation2 + $0x170] sm:$0xff] %vm171_vm0, %v353_v16 }
  0x98   : > { %1284 = vmatpush3.msra.mxu1 %v747_v17  ;;  %482 = vrot.lane.b32.xlu0 %v1646_v2, %s1535_s30 }
  0x99   : > { %610 = vrot.lane.b32.xlu1 %v1646_v2, %s1537_s5 }
  0x9a   : > { %v283_v18 = vpop.permute.xlu0 %282  ;;  %v411_v19 = vpop.permute.xlu1 %410  ;;  %v730_v20 = vld [vmem:[#allocation2 + $0xf0] sm:$0xff] }
  0x9b   : > { %v762_v21 = vld [vmem:[#allocation2 + $0x1f0] sm:$0xff]  ;;  %287 = vst.msk [vmem:[#allocation2 + $0xe8] sm:$0xff] %vm171_vm0, %v283_v18  ;;  %415 = vst.msk [vmem:[#allocation2 + $0x1e8] sm:$0xff] %vm171_vm0, %v411_v19  ;;  %1247 = vmatprep.subr.mxu0 %v730_v20 }
  0x9c   : > { %1285 = vmatprep.subr.mxu1 %v762_v21  ;;  %544 = vrot.lane.b32.xlu0 %v1658_v3, %s1534_s29  ;;  %s2175_s29 = smov 107  }
  0x9d   : > { %672 = vrot.lane.b32.xlu1 %v1658_v3, %s1536_s4  ;;  %s2177_s4 = smov 100  }
  0x9e   : > { %v219_v22 = vpop.permute.xlu0 %218  ;;  %v347_v23 = vpop.permute.xlu1 %346  ;;  %v714_v24 = vld [vmem:[#allocation2 + $0x70] sm:$0xff] }
  0x9f   : > { %v746_v25 = vld [vmem:[#allocation2 + $0x170] sm:$0xff]  ;;  %223 = vst.msk [vmem:[#allocation2 + $0x68] sm:$0xff] %vm171_vm0, %v219_v22  ;;  %351 = vst.msk [vmem:[#allocation2 + $0x168] sm:$0xff] %vm171_vm0, %v347_v23  ;;  %1248 = vmatpush3.msra.mxu0 %v714_v24 }
  0xa0   : > { %1286 = vmatpush3.msra.mxu1 %v746_v25  ;;  %480 = vrot.lane.b32.xlu0 %v1658_v3, %s1535_s30  ;;  %s2176_s30 = smov 116  }
  0xa1   : > { %608 = vrot.lane.b32.xlu1 %v1658_v3, %s1537_s5  ;;  %s2178_s5 = smov 124  }
  0xa2   : > { %v281_v26 = vpop.permute.xlu0 %280  ;;  %v409_v27 = vpop.permute.xlu1 %408  ;;  %v729_v28 = vld [vmem:[#allocation2 + $0xe8] sm:$0xff] }
  0xa3   : > { %v761_v29 = vld [vmem:[#allocation2 + $0x1e8] sm:$0xff]  ;;  %286 = vst.msk [vmem:[#allocation2 + $0xe0] sm:$0xff] %vm171_vm0, %v281_v26  ;;  %414 = vst.msk [vmem:[#allocation2 + $0x1e0] sm:$0xff] %vm171_vm0, %v409_v27  ;;  %1249 = vmatprep.subr.mxu0 %v729_v28 }
  0xa4   : > { %1287 = vmatprep.subr.mxu1 %v761_v29  ;;  %538 = vrot.lane.b32.xlu0 %v1646_v2, %s1538_s6 }
  0xa5   : > { %666 = vrot.lane.b32.xlu1 %v1646_v2, %s1539_s7 }
  0xa6   : > { %v217_v30 = vpop.permute.xlu0 %216  ;;  %v345_v31 = vpop.permute.xlu1 %344  ;;  %v713_v32 = vld [vmem:[#allocation2 + $0x68] sm:$0xff] }
  0xa7   : > { %v745_v33 = vld [vmem:[#allocation2 + $0x168] sm:$0xff]  ;;  %222 = vst.msk [vmem:[#allocation2 + $0x60] sm:$0xff] %vm171_vm0, %v217_v30  ;;  %350 = vst.msk [vmem:[#allocation2 + $0x160] sm:$0xff] %vm171_vm0, %v345_v31  ;;  %1250 = vmatpush3.msra.mxu0 %v713_v32 }
  0xa8   : > { %1288 = vmatpush3.msra.mxu1 %v745_v33  ;;  %474 = vrot.lane.b32.xlu0 %v1646_v2, %s1540_s8 }
  0xa9   : > { %602 = vrot.lane.b32.xlu1 %v1646_v2, %s1541_s9 }
  0xaa   : > { %v275_v34 = vpop.permute.xlu0 %274  ;;  %v403_v35 = vpop.permute.xlu1 %402  ;;  %v728_v36 = vld [vmem:[#allocation2 + $0xe0] sm:$0xff] }
  0xab   : > { %v760_v37 = vld [vmem:[#allocation2 + $0x1e0] sm:$0xff]  ;;  %279 = vst.msk [vmem:[#allocation2 + $0xd8] sm:$0xff] %vm171_vm0, %v275_v34  ;;  %407 = vst.msk [vmem:[#allocation2 + $0x1d8] sm:$0xff] %vm171_vm0, %v403_v35  ;;  %1251 = vmatprep.subr.mxu0 %v728_v36 }
  0xac   : > { %1289 = vmatprep.subr.mxu1 %v760_v37  ;;  %536 = vrot.lane.b32.xlu0 %v1658_v3, %s1538_s6  ;;  %s2179_s6 = smov 108  }
  0xad   : > { %664 = vrot.lane.b32.xlu1 %v1658_v3, %s1539_s7  ;;  %s2180_s7 = smov 117  }
  0xae   : > { %v211_v38 = vpop.permute.xlu0 %210  ;;  %v339_v39 = vpop.permute.xlu1 %338  ;;  %v712_v40 = vld [vmem:[#allocation2 + $0x60] sm:$0xff] }
  0xaf   : > { %v744_v41 = vld [vmem:[#allocation2 + $0x160] sm:$0xff]  ;;  %215 = vst.msk [vmem:[#allocation2 + $0x58] sm:$0xff] %vm171_vm0, %v211_v38  ;;  %343 = vst.msk [vmem:[#allocation2 + $0x158] sm:$0xff] %vm171_vm0, %v339_v39  ;;  %1252 = vmatpush3.msra.mxu0 %v712_v40 }
  0xb0   : > { %1290 = vmatpush3.msra.mxu1 %v744_v41  ;;  %472 = vrot.lane.b32.xlu0 %v1658_v3, %s1540_s8  ;;  %s2181_s8 = smov 101  }
  0xb1   : > { %600 = vrot.lane.b32.xlu1 %v1658_v3, %s1541_s9  ;;  %s2182_s9 = smov 125  }
  0xb2   : > { %v273_v42 = vpop.permute.xlu0 %272  ;;  %v401_v43 = vpop.permute.xlu1 %400  ;;  %v727_v44 = vld [vmem:[#allocation2 + $0xd8] sm:$0xff] }
  0xb3   : > { %v759_v45 = vld [vmem:[#allocation2 + $0x1d8] sm:$0xff]  ;;  %278 = vst.msk [vmem:[#allocation2 + $0xd0] sm:$0xff] %vm171_vm0, %v273_v42  ;;  %406 = vst.msk [vmem:[#allocation2 + $0x1d0] sm:$0xff] %vm171_vm0, %v401_v43  ;;  %1253 = vmatprep.subr.mxu0 %v727_v44 }
  0xb4   : > { %1291 = vmatprep.subr.mxu1 %v759_v45  ;;  %530 = vrot.lane.b32.xlu0 %v1646_v2, %s1542_s10 }
  0xb5   : > { %658 = vrot.lane.b32.xlu1 %v1646_v2, %s1543_s11 }
  0xb6   : > { %v209_v46 = vpop.permute.xlu0 %208  ;;  %v337_v47 = vpop.permute.xlu1 %336  ;;  %v711_v48 = vld [vmem:[#allocation2 + $0x58] sm:$0xff] }
  0xb7   : > { %v743_v49 = vld [vmem:[#allocation2 + $0x158] sm:$0xff]  ;;  %214 = vst.msk [vmem:[#allocation2 + $0x50] sm:$0xff] %vm171_vm0, %v209_v46  ;;  %342 = vst.msk [vmem:[#allocation2 + $0x150] sm:$0xff] %vm171_vm0, %v337_v47  ;;  %1254 = vmatpush3.msra.mxu0 %v711_v48 }
  0xb8   : > { %1292 = vmatpush3.msra.mxu1 %v743_v49  ;;  %466 = vrot.lane.b32.xlu0 %v1646_v2, %s1544_s17 }
  0xb9   : > { %594 = vrot.lane.b32.xlu1 %v1646_v2, %s2175_s29 }
  0xba   : > { %v267_v50 = vpop.permute.xlu0 %266  ;;  %v395_v51 = vpop.permute.xlu1 %394  ;;  %v726_v52 = vld [vmem:[#allocation2 + $0xd0] sm:$0xff] }
  0xbb   : > { %v758_v53 = vld [vmem:[#allocation2 + $0x1d0] sm:$0xff]  ;;  %271 = vst.msk [vmem:[#allocation2 + $0xc8] sm:$0xff] %vm171_vm0, %v267_v50  ;;  %399 = vst.msk [vmem:[#allocation2 + $0x1c8] sm:$0xff] %vm171_vm0, %v395_v51  ;;  %1255 = vmatprep.subr.mxu0 %v726_v52 }
  0xbc   : > { %1293 = vmatprep.subr.mxu1 %v758_v53  ;;  %528 = vrot.lane.b32.xlu0 %v1658_v3, %s1542_s10  ;;  %s2183_s10 = smov 109  }
  0xbd   : > { %656 = vrot.lane.b32.xlu1 %v1658_v3, %s1543_s11  ;;  %s2184_s11 = smov 118  }
  0xbe   : > { %v203_v54 = vpop.permute.xlu0 %202  ;;  %v331_v55 = vpop.permute.xlu1 %330  ;;  %v710_v56 = vld [vmem:[#allocation2 + $0x50] sm:$0xff] }
  0xbf   : > { %v742_v57 = vld [vmem:[#allocation2 + $0x150] sm:$0xff]  ;;  %207 = vst.msk [vmem:[#allocation2 + $0x48] sm:$0xff] %vm171_vm0, %v203_v54  ;;  %335 = vst.msk [vmem:[#allocation2 + $0x148] sm:$0xff] %vm171_vm0, %v331_v55  ;;  %1256 = vmatpush3.msra.mxu0 %v710_v56 }
  0xc0   : > { %1294 = vmatpush3.msra.mxu1 %v742_v57  ;;  %464 = vrot.lane.b32.xlu0 %v1658_v3, %s1544_s17  ;;  %s2185_s17 = smov 126  }
  0xc1   : > { %592 = vrot.lane.b32.xlu1 %v1658_v3, %s2175_s29  ;;  %s2191_s29 = smov 120  }
  0xc2   : > { %v265_v58 = vpop.permute.xlu0 %264  ;;  %v393_v59 = vpop.permute.xlu1 %392  ;;  %v725_v60 = vld [vmem:[#allocation2 + $0xc8] sm:$0xff] }
  0xc3   : > { %v757_v61 = vld [vmem:[#allocation2 + $0x1c8] sm:$0xff]  ;;  %270 = vst.msk [vmem:[#allocation2 + $0xc0] sm:$0xff] %vm171_vm0, %v265_v58  ;;  %398 = vst.msk [vmem:[#allocation2 + $0x1c0] sm:$0xff] %vm171_vm0, %v393_v59  ;;  %1257 = vmatprep.subr.mxu0 %v725_v60 }
  0xc4   : > { %1295 = vmatprep.subr.mxu1 %v757_v61  ;;  %522 = vrot.lane.b32.xlu0 %v1646_v2, %s2176_s30  ;;  %v701_v60 = vld [vmem:[#allocation2 + $0x8] sm:$0xff] }
  0xc5   : > { %650 = vrot.lane.b32.xlu1 %v1646_v2, %s2177_s4 }
  0xc6   : > { %v201_v62 = vpop.permute.xlu0 %200  ;;  %v329_v63 = vpop.permute.xlu1 %328  ;;  %v709_v0 = vld [vmem:[#allocation2 + $0x48] sm:$0xff] }
  0xc7   : > { %v741_v1 = vld [vmem:[#allocation2 + $0x148] sm:$0xff]  ;;  %206 = vst.msk [vmem:[#allocation2 + $0x40] sm:$0xff] %vm171_vm0, %v201_v62  ;;  %334 = vst.msk [vmem:[#allocation2 + $0x140] sm:$0xff] %vm171_vm0, %v329_v63  ;;  %1258 = vmatpush3.msra.mxu0 %v709_v0 }
  0xc8   : > { %1296 = vmatpush3.msra.mxu1 %v741_v1  ;;  %458 = vrot.lane.b32.xlu0 %v1646_v2, %s2178_s5  ;;  %v700_v1 = vld [vmem:[#allocation2] sm:$0xff] }
  0xc9   : > { %586 = vrot.lane.b32.xlu1 %v1646_v2, %s2179_s6 }
  0xca   : > { %v259_v4 = vpop.permute.xlu0 %258  ;;  %v387_v5 = vpop.permute.xlu1 %386  ;;  %v724_v6 = vld [vmem:[#allocation2 + $0xc0] sm:$0xff] }
  0xcb   : > { %v756_v7 = vld [vmem:[#allocation2 + $0x1c0] sm:$0xff]  ;;  %263 = vst.msk [vmem:[#allocation2 + $0xb8] sm:$0xff] %vm171_vm0, %v259_v4  ;;  %391 = vst.msk [vmem:[#allocation2 + $0x1b8] sm:$0xff] %vm171_vm0, %v387_v5  ;;  %1259 = vmatprep.subr.mxu0 %v724_v6 }
  0xcc   : > { %1297 = vmatprep.subr.mxu1 %v756_v7  ;;  %520 = vrot.lane.b32.xlu0 %v1658_v3, %s2176_s30  ;;  %v692_v7 = vld [vmem:[%s2136_s1] sm:$0xff] }
  0xcd   : > { %648 = vrot.lane.b32.xlu1 %v1658_v3, %s2177_s4 }
  0xce   : > { %v195_v8 = vpop.permute.xlu0 %194  ;;  %v323_v9 = vpop.permute.xlu1 %322  ;;  %v708_v10 = vld [vmem:[#allocation2 + $0x40] sm:$0xff] }
  0xcf   : > { %v740_v11 = vld [vmem:[#allocation2 + $0x140] sm:$0xff]  ;;  %199 = vst.msk [vmem:[#allocation2 + $0x38] sm:$0xff] %vm171_vm0, %v195_v8  ;;  %327 = vst.msk [vmem:[#allocation2 + $0x138] sm:$0xff] %vm171_vm0, %v323_v9  ;;  %1260 = vmatpush3.msra.mxu0 %v708_v10  ;;  %v697_v9 = vld [vmem:[%s2136_s1 + $0x28] sm:$0xff] }
  0xd0   : > { %1298 = vmatpush3.msra.mxu1 %v740_v11  ;;  %456 = vrot.lane.b32.xlu0 %v1658_v3, %s2178_s5 }
  0xd1   : > { %584 = vrot.lane.b32.xlu1 %v1658_v3, %s2179_s6 }
  0xd2   : > { %v257_v12 = vpop.permute.xlu0 %256  ;;  %v385_v13 = vpop.permute.xlu1 %384  ;;  %v723_v14 = vld [vmem:[#allocation2 + $0xb8] sm:$0xff] }
  0xd3   : > { %v755_v15 = vld [vmem:[#allocation2 + $0x1b8] sm:$0xff]  ;;  %262 = vst.msk [vmem:[#allocation2 + $0xb0] sm:$0xff] %vm171_vm0, %v257_v12  ;;  %390 = vst.msk [vmem:[#allocation2 + $0x1b0] sm:$0xff] %vm171_vm0, %v385_v13  ;;  %1261 = vmatprep.subr.mxu0 %v723_v14  ;;  %v694_v13 = vld [vmem:[%s2136_s1 + $0x10] sm:$0xff] }
  0xd4   : > { %1299 = vmatprep.subr.mxu1 %v755_v15  ;;  %514 = vrot.lane.b32.xlu0 %v1646_v2, %s2180_s7  ;;  %v696_v15 = vld [vmem:[%s2136_s1 + $0x20] sm:$0xff] }
  0xd5   : > { %642 = vrot.lane.b32.xlu1 %v1646_v2, %s2181_s8 }
  0xd6   : > { %v193_v16 = vpop.permute.xlu0 %192  ;;  %v321_v17 = vpop.permute.xlu1 %320  ;;  %v707_v18 = vld [vmem:[#allocation2 + $0x38] sm:$0xff] }
  0xd7   : > { %v739_v19 = vld [vmem:[#allocation2 + $0x138] sm:$0xff]  ;;  %198 = vst.msk [vmem:[#allocation2 + $0x30] sm:$0xff] %vm171_vm0, %v193_v16  ;;  %326 = vst.msk [vmem:[#allocation2 + $0x130] sm:$0xff] %vm171_vm0, %v321_v17  ;;  %1262 = vmatpush3.msra.mxu0 %v707_v18  ;;  %v1231_v16 = vld [vmem:[%s2136_s1 + $0x48] sm:$0xff] }
  0xd8   : > { %1300 = vmatpush3.msra.mxu1 %v739_v19  ;;  %450 = vrot.lane.b32.xlu0 %v1646_v2, %s2182_s9  ;;  %v698_v19 = vld [vmem:[%s2136_s1 + $0x30] sm:$0xff] }
  0xd9   : > { %578 = vrot.lane.b32.xlu1 %v1646_v2, %s2183_s10 }
  0xda   : > { %v251_v20 = vpop.permute.xlu0 %250  ;;  %v379_v21 = vpop.permute.xlu1 %378  ;;  %v722_v22 = vld [vmem:[#allocation2 + $0xb0] sm:$0xff] }
  0xdb   : > { %v754_v23 = vld [vmem:[#allocation2 + $0x1b0] sm:$0xff]  ;;  %255 = vst.msk [vmem:[#allocation2 + $0xa8] sm:$0xff] %vm171_vm0, %v251_v20  ;;  %383 = vst.msk [vmem:[#allocation2 + $0x1a8] sm:$0xff] %vm171_vm0, %v379_v21  ;;  %1263 = vmatprep.subr.mxu0 %v722_v22  ;;  %v680_v20 = vld [vmem:[%s2137_s2] sm:$0xff] }
  0xdc   : > { %1301 = vmatprep.subr.mxu1 %v754_v23  ;;  %512 = vrot.lane.b32.xlu0 %v1658_v3, %s2180_s7  ;;  %v1565_v23 = vmov 0  }
  0xdd   : > { %640 = vrot.lane.b32.xlu1 %v1658_v3, %s2181_s8  ;;  %1470 = vset.pattern.permute.xlu0 %v1565_v23  ;;  %s1566_s8 = smov [#allocation3]  }
  0xde   : > { %v187_v24 = vpop.permute.xlu0 %186  ;;  %v315_v25 = vpop.permute.xlu1 %314  ;;  %v706_v26 = vld [vmem:[#allocation2 + $0x30] sm:$0xff]  ;;  %1471 = vset.pattern.permute.xlu1 %v1565_v23 }
  0xdf   : > { %v738_v27 = vld [vmem:[#allocation2 + $0x130] sm:$0xff]  ;;  %191 = vst.msk [vmem:[#allocation2 + $0x28] sm:$0xff] %vm171_vm0, %v187_v24  ;;  %319 = vst.msk [vmem:[#allocation2 + $0x128] sm:$0xff] %vm171_vm0, %v315_v25  ;;  %1264 = vmatpush3.msra.mxu0 %v706_v26  ;;  %v681_v24 = vld [vmem:[%s2137_s2 + $0x8] sm:$0xff] }
  0xe0   : > { %1302 = vmatpush3.msra.mxu1 %v738_v27  ;;  %448 = vrot.lane.b32.xlu0 %v1658_v3, %s2182_s9  ;;  %s1476_s9 = sshll.u32 %s1566_s8, 4  ;;  %s1477_s9 = int_to_ptr.vmem [resolvable:$false] %s1476_s9 }
  0xe1   : > { %576 = vrot.lane.b32.xlu1 %v1658_v3, %s2183_s10  ;;  %s1478_s10 = scalar_lea.vmem %s1477_s9, 512 }
  0xe2   : > { %v249_v28 = vpop.permute.xlu0 %248  ;;  %v377_v29 = vpop.permute.xlu1 %376  ;;  %v721_v30 = vld [vmem:[#allocation2 + $0xa8] sm:$0xff] }
  0xe3   : > { %v753_v31 = vld [vmem:[#allocation2 + $0x1a8] sm:$0xff]  ;;  %254 = vst.msk [vmem:[#allocation2 + $0xa0] sm:$0xff] %vm171_vm0, %v249_v28  ;;  %382 = vst.msk [vmem:[#allocation2 + $0x1a0] sm:$0xff] %vm171_vm0, %v377_v29  ;;  %1265 = vmatprep.subr.mxu0 %v721_v30 }
  0xe4   : > { %1303 = vmatprep.subr.mxu1 %v753_v31  ;;  %506 = vrot.lane.b32.xlu0 %v1646_v2, %s2184_s11 }
  0xe5   : > { %634 = vrot.lane.b32.xlu1 %v1646_v2, %s1555_s25 }
  0xe6   : > { %v185_v32 = vpop.permute.xlu0 %184  ;;  %v313_v33 = vpop.permute.xlu1 %312  ;;  %v705_v34 = vld [vmem:[#allocation2 + $0x28] sm:$0xff] }
  0xe7   : > { %v737_v35 = vld [vmem:[#allocation2 + $0x128] sm:$0xff]  ;;  %190 = vst.msk [vmem:[#allocation2 + $0x20] sm:$0xff] %vm171_vm0, %v185_v32  ;;  %318 = vst.msk [vmem:[#allocation2 + $0x120] sm:$0xff] %vm171_vm0, %v313_v33  ;;  %1266 = vmatpush3.msra.mxu0 %v705_v34 }
  0xe8   : > { %1304 = vmatpush3.msra.mxu1 %v737_v35  ;;  %442 = vrot.lane.b32.xlu0 %v1646_v2, %s2185_s17 }
  0xe9   : > { %570 = vrot.lane.b32.xlu1 %v1646_v2, %s2186_s20 }
  0xea   : > { %v243_v36 = vpop.permute.xlu0 %242  ;;  %v371_v37 = vpop.permute.xlu1 %370  ;;  %v720_v38 = vld [vmem:[#allocation2 + $0xa0] sm:$0xff] }
  0xeb   : > { %v752_v39 = vld [vmem:[#allocation2 + $0x1a0] sm:$0xff]  ;;  %247 = vst.msk [vmem:[#allocation2 + $0x98] sm:$0xff] %vm171_vm0, %v243_v36  ;;  %375 = vst.msk [vmem:[#allocation2 + $0x198] sm:$0xff] %vm171_vm0, %v371_v37  ;;  %1267 = vmatprep.subr.mxu0 %v720_v38 }
  0xec   : > { %1305 = vmatprep.subr.mxu1 %v752_v39  ;;  %504 = vrot.lane.b32.xlu0 %v1658_v3, %s2184_s11 }
  0xed   : > { %632 = vrot.lane.b32.xlu1 %v1658_v3, %s1555_s25  ;;  %s2187_s25 = smov 119  }
  0xee   : > { %v179_v40 = vpop.permute.xlu0 %178  ;;  %v307_v41 = vpop.permute.xlu1 %306  ;;  %v704_v42 = vld [vmem:[#allocation2 + $0x20] sm:$0xff] }
  0xef   : > { %v736_v43 = vld [vmem:[#allocation2 + $0x120] sm:$0xff]  ;;  %183 = vst.msk [vmem:[#allocation2 + $0x18] sm:$0xff] %vm171_vm0, %v179_v40  ;;  %311 = vst.msk [vmem:[#allocation2 + $0x118] sm:$0xff] %vm171_vm0, %v307_v41  ;;  %1268 = vmatpush3.msra.mxu0 %v704_v42 }
  0xf0   : > { %1306 = vmatpush3.msra.mxu1 %v736_v43  ;;  %440 = vrot.lane.b32.xlu0 %v1658_v3, %s2185_s17 }
  0xf1   : > { %568 = vrot.lane.b32.xlu1 %v1658_v3, %s2186_s20 }
  0xf2   : > { %v241_v44 = vpop.permute.xlu0 %240  ;;  %v369_v45 = vpop.permute.xlu1 %368  ;;  %v719_v46 = vld [vmem:[#allocation2 + $0x98] sm:$0xff] }
  0xf3   : > { %v751_v47 = vld [vmem:[#allocation2 + $0x198] sm:$0xff]  ;;  %246 = vst.msk [vmem:[#allocation2 + $0x90] sm:$0xff] %vm171_vm0, %v241_v44  ;;  %374 = vst.msk [vmem:[#allocation2 + $0x190] sm:$0xff] %vm171_vm0, %v369_v45  ;;  %1269 = vmatprep.subr.mxu0 %v719_v46 }
  0xf4   : > { %1307 = vmatprep.subr.mxu1 %v751_v47  ;;  %498 = vrot.lane.b32.xlu0 %v1646_v2, %s2187_s25 }
  0xf5   : > { %626 = vrot.lane.b32.xlu1 %v1646_v2, %s2188_s26 }
  0xf6   : > { %v177_v48 = vpop.permute.xlu0 %176  ;;  %v305_v49 = vpop.permute.xlu1 %304  ;;  %v703_v50 = vld [vmem:[#allocation2 + $0x18] sm:$0xff] }
  0xf7   : > { %v735_v51 = vld [vmem:[#allocation2 + $0x118] sm:$0xff]  ;;  %182 = vst.msk [vmem:[#allocation2 + $0x10] sm:$0xff] %vm171_vm0, %v177_v48  ;;  %310 = vst.msk [vmem:[#allocation2 + $0x110] sm:$0xff] %vm171_vm0, %v305_v49  ;;  %1270 = vmatpush3.msra.mxu0 %v703_v50 }
  0xf8   : > { %1308 = vmatpush3.msra.mxu1 %v735_v51  ;;  %434 = vrot.lane.b32.xlu0 %v1646_v2, %s2189_s27 }
  0xf9   : > { %562 = vrot.lane.b32.xlu1 %v1646_v2, %s2190_s28 }
  0xfa   : > { %v235_v52 = vpop.permute.xlu0 %234  ;;  %v363_v53 = vpop.permute.xlu1 %362  ;;  %v718_v54 = vld [vmem:[#allocation2 + $0x90] sm:$0xff] }
  0xfb   : > { %v750_v55 = vld [vmem:[#allocation2 + $0x190] sm:$0xff]  ;;  %239 = vst.msk [vmem:[#allocation2 + $0x88] sm:$0xff] %vm171_vm0, %v235_v52  ;;  %367 = vst.msk [vmem:[#allocation2 + $0x188] sm:$0xff] %vm171_vm0, %v363_v53  ;;  %1271 = vmatprep.subr.mxu0 %v718_v54 }
  0xfc   : > { %1309 = vmatprep.subr.mxu1 %v750_v55  ;;  %496 = vrot.lane.b32.xlu0 %v1658_v3, %s2187_s25 }
  0xfd   : > { %624 = vrot.lane.b32.xlu1 %v1658_v3, %s2188_s26 }
  0xfe   : > { %v299_v56 = vpop.permute.xlu0 %298  ;;  %v233_v57 = vpop.permute.xlu1 %232  ;;  %v702_v58 = vld [vmem:[#allocation2 + $0x10] sm:$0xff] }
  0xff   : > { %v734_v59 = vld [vmem:[#allocation2 + $0x110] sm:$0xff]  ;;  %303 = vst.msk [vmem:[#allocation2 + $0x108] sm:$0xff] %vm171_vm0, %v299_v56  ;;  %238 = vst.msk [vmem:[#allocation2 + $0x80] sm:$0xff] %vm171_vm0, %v233_v57  ;;  %1272 = vmatpush3.msra.mxu0 %v702_v58 }
 0x100   : > { %1310 = vmatpush3.msra.mxu1 %v734_v59  ;;  %432 = vrot.lane.b32.xlu0 %v1658_v3, %s2189_s27 }
 0x101   : > { %560 = vrot.lane.b32.xlu1 %v1658_v3, %s2190_s28  ;;  %s161_s28 = sand.u32 1, %s1524_s13  }
 0x102   : > { %v361_v61 = vpop.permute.xlu0 %360  ;;  %v297_v62 = vpop.permute.xlu1 %296  ;;  %v717_v63 = vld [vmem:[#allocation2 + $0x88] sm:$0xff]  ;;  %s2095_s7 = scalar_lea.sflag [#allocation4], %s161_s28 }
 0x103   : > { %v749_v0 = vld [vmem:[#allocation2 + $0x188] sm:$0xff]  ;;  %366 = vst.msk [vmem:[#allocation2 + $0x180] sm:$0xff] %vm171_vm0, %v361_v61  ;;  %302 = vst.msk [vmem:[#allocation2 + $0x100] sm:$0xff] %vm171_vm0, %v297_v62  ;;  %1273 = vmatprep.subr.mxu0 %v717_v63 }
 0x104   : > { %1311 = vmatprep.subr.mxu1 %v749_v0  ;;  %490 = vrot.lane.b32.xlu0 %v1646_v2, %s2191_s29 }
 0x105   : > { %1274 = vmatpush3.msra.mxu0 %v701_v60  ;;  %618 = vrot.lane.b32.xlu1 %v1646_v2, %s1563_s24 }
 0x106   : > { %v547_v4 = vpop.permute.xlu0 %546  ;;  %v733_v5 = vld [vmem:[#allocation2 + $0x108] sm:$0xff]  ;;  %v716_v6 = vld [vmem:[#allocation2 + $0x80] sm:$0xff] }
 0x107   : > { %551 = vst.msk [vmem:[#allocation2 + $0x2f8] sm:$0xff] %vm171_vm0, %v547_v4  ;;  %v675_v8 = vpop.permute.xlu1 %674  ;;  %1312 = vmatpush3.msra.mxu1 %v733_v5  ;;  %1275 = vmatprep.subr.mxu0 %v716_v6 }
 0x108   : > { %679 = vst.msk [vmem:[#allocation2 + $0x3f8] sm:$0xff] %vm171_vm0, %v675_v8  ;;  %554 = vrot.lane.b32.xlu0 %v1646_v2, %s1564_s19  ;;  %1276 = vmatpush3.msra.mxu0 %v700_v1  ;;  %v699_v2 = vld [vmem:[%s2136_s1 + $0x38] sm:$0xff] }
 0x109   : > { %488 = vrot.lane.b32.xlu1 %v1658_v3, %s2191_s29  ;;  %829 = vmatmul.mubr.f32.vlgmr.msra.gmra.mxu0 %v692_v7  ;;  %s1225_s29 = sshll.u32 %s161_s28, 4 }
 0x10a   : > { %v483_v10 = vpop.permute.xlu0 %482  ;;  %v748_v11 = vld [vmem:[#allocation2 + $0x180] sm:$0xff]  ;;  %833 = vmatprep.mubr.f32.mxu0 %v697_v9 }
 0x10b   : > { %v732_v12 = vld [vmem:[#allocation2 + $0x100] sm:$0xff]  ;;  %487 = vst.msk [vmem:[#allocation2 + $0x278] sm:$0xff] %vm171_vm0, %v483_v10  ;;  %v611_v14 = vpop.permute.xlu1 %610  ;;  %1313 = vmatprep.subr.mxu1 %v748_v11 }
 0x10c   : > { %615 = vst.msk [vmem:[#allocation2 + $0x378] sm:$0xff] %vm171_vm0, %v611_v14  ;;  %616 = vrot.lane.b32.xlu0 %v1658_v3, %s1563_s24  ;;  %1314 = vmatpush3.msra.mxu1 %v732_v12  ;;  %s163_s24 = scalar_lea.vmem [#allocation3], %s1225_s29 }
 0x10d   : > { %552 = vrot.lane.b32.xlu1 %v1658_v3, %s1564_s19  ;;  %904 = vmatmul.mubr.f32.vlgmr.msra.gmra.mxu1 %v694_v13  ;;  %v1233_v3 = vld [vmem:[%s2136_s1 + $0x58] sm:$0xff]  ;;  %s1244_s19 = sshll.u32 %s1610_s16, 8  ;;  %s1159_s30 = sshll.u32 %s163_s24, 4  ;;  %s2092_s30 = int_to_ptr.vmem [resolvable:$true] %s1159_s30 }
 0x10e   : > { %v545_v17 = vpop.permute.xlu0 %544  ;;  %v956_v18 = vld [vmem:[#allocation2 + $0x2f8] sm:$0xff]  ;;  %908 = vmatprep.mubr.f32.mxu1 %v699_v2  ;;  %834 = vmatmul.mubr.f32.gmra.mxu0 %v696_v15  ;;  %s2090_s6 = scalar_lea.hbm %s2138_s3, %s1244_s19  ;;  %s1472_s16 = scalar_lea.vmem %s2092_s30, 256 }
 0x10f   : > { %550 = vst.msk [vmem:[#allocation2 + $0x2f0] sm:$0xff] %vm171_vm0, %v545_v17  ;;  %v673_v21 = vpop.permute.xlu1 %672  ;;  %1321 = vmatprep.subr.mxu0 %v956_v18  ;;  %v988_v22 = vld [vmem:[#allocation2 + $0x3f8] sm:$0xff]  ;;  %1053 = vmatprep.mubr.f32.mxu0 %v1231_v16  ;;  %p1473_p11 = scmp.ne.s32.totalorder %s2092_s30, %s1472_s16  ;;  %p1479_p0 = scmp.lt.s32.totalorder %s2092_s30, %s1477_s9 }
 0x110   : > { %678 = vst.msk [vmem:[#allocation2 + $0x3f0] sm:$0xff] %vm171_vm0, %v673_v21  ;;  %1359 = vmatprep.subr.mxu1 %v988_v22  ;;  %684 = vperm.xlu0 %1470, %v680_v20   ;;  %p1480_p1 = scmp.lt.s32.totalorder %s1478_s10, %s1472_s16 }
 0x111   : > { %909 = vmatmul.mubr.f32.gmra.mxu1 %v698_v19  ;;  %689 = vperm.xlu1 %1471, %v681_v24   ;;  %p1474_p12 = pnand %p1473_p11, %p1627_p5 }
 0x112   : > { %v481_v25 = vpop.permute.xlu0 %480  ;;  %v940_v26 = vld [vmem:[#allocation2 + $0x278] sm:$0xff]  ;;  %1128 = vmatprep.mubr.f32.mxu1 %v1233_v3  ;;  %p1481_p2 = por %p1480_p1, %p1479_p0 }
 0x113   : > { %486 = vst.msk [vmem:[#allocation2 + $0x270] sm:$0xff] %vm171_vm0, %v481_v25  ;;  %v609_v27 = vpop.permute.xlu1 %608  ;;  %1322 = vmatpush3.msra.mxu0 %v940_v26  ;;  %v972_v28 = vld [vmem:[#allocation2 + $0x378] sm:$0xff]  ;;  %p1475_p13 = pneg %p1474_p12 }
 0x114   : > { %614 = vst.msk [vmem:[#allocation2 + $0x370] sm:$0xff] %vm171_vm0, %v609_v27  ;;  %1360 = vmatpush3.msra.mxu1 %v972_v28 }
 0x115   : > { %p1482_p3 = pnand %p1481_p2, %p1475_p13 }
 0x116   : > { %v539_v29 = vpop.permute.xlu0 %538  ;;  %v955_v30 = vld [vmem:[#allocation2 + $0x2f0] sm:$0xff] }
 0x117   : > { %543 = vst.msk [vmem:[#allocation2 + $0x2e8] sm:$0xff] %vm171_vm0, %v539_v29  ;;  %v667_v31 = vpop.permute.xlu1 %666  ;;  %1323 = vmatprep.subr.mxu0 %v955_v30  ;;  %v987_v32 = vld [vmem:[#allocation2 + $0x3f0] sm:$0xff] }
 0x118   : > { %671 = vst.msk [vmem:[#allocation2 + $0x3e8] sm:$0xff] %vm171_vm0, %v667_v31  ;;  %1361 = vmatprep.subr.mxu1 %v987_v32 }
 0x11a   : > { %v475_v33 = vpop.permute.xlu0 %474  ;;  %v939_v34 = vld [vmem:[#allocation2 + $0x270] sm:$0xff] }
 0x11b   : > { %479 = vst.msk [vmem:[#allocation2 + $0x268] sm:$0xff] %vm171_vm0, %v475_v33  ;;  %v603_v35 = vpop.permute.xlu1 %602  ;;  %1324 = vmatpush3.msra.mxu0 %v939_v34  ;;  %v971_v36 = vld [vmem:[#allocation2 + $0x370] sm:$0xff] }
 0x11c   : > { %607 = vst.msk [vmem:[#allocation2 + $0x368] sm:$0xff] %vm171_vm0, %v603_v35  ;;  %1362 = vmatpush3.msra.mxu1 %v971_v36 }
 0x11e   : > { %v537_v37 = vpop.permute.xlu0 %536  ;;  %v954_v38 = vld [vmem:[#allocation2 + $0x2e8] sm:$0xff] }
 0x11f   : > { %542 = vst.msk [vmem:[#allocation2 + $0x2e0] sm:$0xff] %vm171_vm0, %v537_v37  ;;  %v665_v39 = vpop.permute.xlu1 %664  ;;  %1325 = vmatprep.subr.mxu0 %v954_v38  ;;  %v986_v40 = vld [vmem:[#allocation2 + $0x3e8] sm:$0xff] }
 0x120   : > { %670 = vst.msk [vmem:[#allocation2 + $0x3e0] sm:$0xff] %vm171_vm0, %v665_v39  ;;  %1363 = vmatprep.subr.mxu1 %v986_v40 }
 0x122   : > { %v473_v41 = vpop.permute.xlu0 %472  ;;  %v938_v42 = vld [vmem:[#allocation2 + $0x268] sm:$0xff] }
 0x123   : > { %478 = vst.msk [vmem:[#allocation2 + $0x260] sm:$0xff] %vm171_vm0, %v473_v41  ;;  %v601_v43 = vpop.permute.xlu1 %600  ;;  %1326 = vmatpush3.msra.mxu0 %v938_v42  ;;  %v970_v44 = vld [vmem:[#allocation2 + $0x368] sm:$0xff] }
 0x124   : > { %606 = vst.msk [vmem:[#allocation2 + $0x360] sm:$0xff] %vm171_vm0, %v601_v43  ;;  %1364 = vmatpush3.msra.mxu1 %v970_v44 }
 0x126   : > { %v531_v45 = vpop.permute.xlu0 %530  ;;  %v953_v46 = vld [vmem:[#allocation2 + $0x2e0] sm:$0xff] }
 0x127   : > { %535 = vst.msk [vmem:[#allocation2 + $0x2d8] sm:$0xff] %vm171_vm0, %v531_v45  ;;  %v659_v47 = vpop.permute.xlu1 %658  ;;  %1327 = vmatprep.subr.mxu0 %v953_v46  ;;  %v985_v48 = vld [vmem:[#allocation2 + $0x3e0] sm:$0xff] }
 0x128   : > { %663 = vst.msk [vmem:[#allocation2 + $0x3d8] sm:$0xff] %vm171_vm0, %v659_v47  ;;  %1365 = vmatprep.subr.mxu1 %v985_v48 }
 0x12a   : > { %v467_v49 = vpop.permute.xlu0 %466  ;;  %v937_v50 = vld [vmem:[#allocation2 + $0x260] sm:$0xff] }
 0x12b   : > { %471 = vst.msk [vmem:[#allocation2 + $0x258] sm:$0xff] %vm171_vm0, %v467_v49  ;;  %v595_v51 = vpop.permute.xlu1 %594  ;;  %1328 = vmatpush3.msra.mxu0 %v937_v50  ;;  %v969_v52 = vld [vmem:[#allocation2 + $0x360] sm:$0xff] }
 0x12c   : > { %599 = vst.msk [vmem:[#allocation2 + $0x358] sm:$0xff] %vm171_vm0, %v595_v51  ;;  %1366 = vmatpush3.msra.mxu1 %v969_v52 }
 0x12e   : > { %v529_v53 = vpop.permute.xlu0 %528  ;;  %v952_v54 = vld [vmem:[#allocation2 + $0x2d8] sm:$0xff] }
 0x12f   : > { %534 = vst.msk [vmem:[#allocation2 + $0x2d0] sm:$0xff] %vm171_vm0, %v529_v53  ;;  %v657_v55 = vpop.permute.xlu1 %656  ;;  %1329 = vmatprep.subr.mxu0 %v952_v54  ;;  %v984_v56 = vld [vmem:[#allocation2 + $0x3d8] sm:$0xff] }
 0x130   : > { %662 = vst.msk [vmem:[#allocation2 + $0x3d0] sm:$0xff] %vm171_vm0, %v657_v55  ;;  %1367 = vmatprep.subr.mxu1 %v984_v56 }
 0x132   : > { %v465_v57 = vpop.permute.xlu0 %464  ;;  %v936_v58 = vld [vmem:[#allocation2 + $0x258] sm:$0xff] }
 0x133   : > { %470 = vst.msk [vmem:[#allocation2 + $0x250] sm:$0xff] %vm171_vm0, %v465_v57  ;;  %v593_v59 = vpop.permute.xlu1 %592  ;;  %1330 = vmatpush3.msra.mxu0 %v936_v58  ;;  %v968_v60 = vld [vmem:[#allocation2 + $0x358] sm:$0xff] }
 0x134   : > { %598 = vst.msk [vmem:[#allocation2 + $0x350] sm:$0xff] %vm171_vm0, %v593_v59  ;;  %1368 = vmatpush3.msra.mxu1 %v968_v60 }
 0x136   : > { %v523_v61 = vpop.permute.xlu0 %522  ;;  %v951_v62 = vld [vmem:[#allocation2 + $0x2d0] sm:$0xff] }
 0x137   : > { %527 = vst.msk [vmem:[#allocation2 + $0x2c8] sm:$0xff] %vm171_vm0, %v523_v61  ;;  %v651_v63 = vpop.permute.xlu1 %650  ;;  %1331 = vmatprep.subr.mxu0 %v951_v62  ;;  %v983_v0 = vld [vmem:[#allocation2 + $0x3d0] sm:$0xff] }
 0x138   : > { %655 = vst.msk [vmem:[#allocation2 + $0x3c8] sm:$0xff] %vm171_vm0, %v651_v63  ;;  %1369 = vmatprep.subr.mxu1 %v983_v0 }
 0x13a   : > { %v459_v1 = vpop.permute.xlu0 %458  ;;  %v935_v4 = vld [vmem:[#allocation2 + $0x250] sm:$0xff] }
 0x13b   : > { %463 = vst.msk [vmem:[#allocation2 + $0x248] sm:$0xff] %vm171_vm0, %v459_v1  ;;  %v587_v5 = vpop.permute.xlu1 %586  ;;  %1332 = vmatpush3.msra.mxu0 %v935_v4  ;;  %v967_v6 = vld [vmem:[#allocation2 + $0x350] sm:$0xff] }
 0x13c   : > { %591 = vst.msk [vmem:[#allocation2 + $0x348] sm:$0xff] %vm171_vm0, %v587_v5  ;;  %1370 = vmatpush3.msra.mxu1 %v967_v6 }
 0x13e   : > { %v521_v7 = vpop.permute.xlu0 %520  ;;  %v950_v8 = vld [vmem:[#allocation2 + $0x2c8] sm:$0xff] }
 0x13f   : > { %526 = vst.msk [vmem:[#allocation2 + $0x2c0] sm:$0xff] %vm171_vm0, %v521_v7  ;;  %v649_v9 = vpop.permute.xlu1 %648  ;;  %1333 = vmatprep.subr.mxu0 %v950_v8  ;;  %v982_v10 = vld [vmem:[#allocation2 + $0x3c8] sm:$0xff] }
 0x140   : > { %654 = vst.msk [vmem:[#allocation2 + $0x3c0] sm:$0xff] %vm171_vm0, %v649_v9  ;;  %1371 = vmatprep.subr.mxu1 %v982_v10  ;;  %v926_v7 = vld [vmem:[#allocation2 + $0x208] sm:$0xff] }
 0x142   : > { %v457_v11 = vpop.permute.xlu0 %456  ;;  %v934_v12 = vld [vmem:[#allocation2 + $0x248] sm:$0xff] }
 0x143   : > { %462 = vst.msk [vmem:[#allocation2 + $0x240] sm:$0xff] %vm171_vm0, %v457_v11  ;;  %v585_v13 = vpop.permute.xlu1 %584  ;;  %1334 = vmatpush3.msra.mxu0 %v934_v12  ;;  %v966_v14 = vld [vmem:[#allocation2 + $0x348] sm:$0xff] }
 0x144   : > { %590 = vst.msk [vmem:[#allocation2 + $0x340] sm:$0xff] %vm171_vm0, %v585_v13  ;;  %1372 = vmatpush3.msra.mxu1 %v966_v14  ;;  %v925_v13 = vld [vmem:[#allocation2 + $0x200] sm:$0xff] }
 0x146   : > { %v515_v2 = vpop.permute.xlu0 %514  ;;  %v949_v15 = vld [vmem:[#allocation2 + $0x2c0] sm:$0xff] }
 0x147   : > { %519 = vst.msk [vmem:[#allocation2 + $0x2b8] sm:$0xff] %vm171_vm0, %v515_v2  ;;  %v643_v16 = vpop.permute.xlu1 %642  ;;  %1335 = vmatprep.subr.mxu0 %v949_v15  ;;  %v981_v17 = vld [vmem:[#allocation2 + $0x3c0] sm:$0xff]  ;;  %v1235_v15 = vld [vmem:[%s2136_s1 + $0x68] sm:$0xff] }
 0x148   : > { %647 = vst.msk [vmem:[#allocation2 + $0x3b8] sm:$0xff] %vm171_vm0, %v643_v16  ;;  %1373 = vmatprep.subr.mxu1 %v981_v17  ;;  %v1230_v2 = vld [vmem:[%s2136_s1 + $0x40] sm:$0xff]  ;;  %v1232_v17 = vld [vmem:[%s2136_s1 + $0x50] sm:$0xff] }
 0x14a   : > { %v451_v18 = vpop.permute.xlu0 %450  ;;  %v933_v19 = vld [vmem:[#allocation2 + $0x240] sm:$0xff] }
 0x14b   : > { %455 = vst.msk [vmem:[#allocation2 + $0x238] sm:$0xff] %vm171_vm0, %v451_v18  ;;  %v579_v20 = vpop.permute.xlu1 %578  ;;  %1336 = vmatpush3.msra.mxu0 %v933_v19  ;;  %v965_v21 = vld [vmem:[#allocation2 + $0x340] sm:$0xff] }
 0x14c   : > { %583 = vst.msk [vmem:[#allocation2 + $0x338] sm:$0xff] %vm171_vm0, %v579_v20  ;;  %1374 = vmatpush3.msra.mxu1 %v965_v21  ;;  %v1234_v19 = vld [vmem:[%s2136_s1 + $0x60] sm:$0xff]  ;;  %v1237_v20 = vld [vmem:[%s2136_s1 + $0x78] sm:$0xff]  ;;  %v1236_v21 = vld [vmem:[%s2136_s1 + $0x70] sm:$0xff] }
 0x14e   : > { %v513_v22 = vpop.permute.xlu0 %512  ;;  %v948_v3 = vld [vmem:[#allocation2 + $0x2b8] sm:$0xff] }
 0x14f   : > { %518 = vst.msk [vmem:[#allocation2 + $0x2b0] sm:$0xff] %vm171_vm0, %v513_v22  ;;  %v641_v23 = vpop.permute.xlu1 %640  ;;  %1337 = vmatprep.subr.mxu0 %v948_v3  ;;  %v980_v24 = vld [vmem:[#allocation2 + $0x3b8] sm:$0xff] }
 0x150   : > { %646 = vst.msk [vmem:[#allocation2 + $0x3b0] sm:$0xff] %vm171_vm0, %v641_v23  ;;  %1375 = vmatprep.subr.mxu1 %v980_v24 }
 0x152   : > { %v449_v25 = vpop.permute.xlu0 %448  ;;  %v932_v26 = vld [vmem:[#allocation2 + $0x238] sm:$0xff] }
 0x153   : > { %454 = vst.msk [vmem:[#allocation2 + $0x230] sm:$0xff] %vm171_vm0, %v449_v25  ;;  %v577_v27 = vpop.permute.xlu1 %576  ;;  %1338 = vmatpush3.msra.mxu0 %v932_v26  ;;  %v964_v28 = vld [vmem:[#allocation2 + $0x338] sm:$0xff] }
 0x154   : > { %582 = vst.msk [vmem:[#allocation2 + $0x330] sm:$0xff] %vm171_vm0, %v577_v27  ;;  %1376 = vmatpush3.msra.mxu1 %v964_v28 }
 0x156   : > { %v507_v29 = vpop.permute.xlu0 %506  ;;  %v947_v30 = vld [vmem:[#allocation2 + $0x2b0] sm:$0xff] }
 0x157   : > { %511 = vst.msk [vmem:[#allocation2 + $0x2a8] sm:$0xff] %vm171_vm0, %v507_v29  ;;  %v635_v31 = vpop.permute.xlu1 %634  ;;  %1339 = vmatprep.subr.mxu0 %v947_v30  ;;  %v979_v32 = vld [vmem:[#allocation2 + $0x3b0] sm:$0xff] }
 0x158   : > { %639 = vst.msk [vmem:[#allocation2 + $0x3a8] sm:$0xff] %vm171_vm0, %v635_v31  ;;  %1377 = vmatprep.subr.mxu1 %v979_v32 }
 0x15a   : > { %v443_v33 = vpop.permute.xlu0 %442  ;;  %v931_v34 = vld [vmem:[#allocation2 + $0x230] sm:$0xff] }
 0x15b   : > { %447 = vst.msk [vmem:[#allocation2 + $0x228] sm:$0xff] %vm171_vm0, %v443_v33  ;;  %v571_v35 = vpop.permute.xlu1 %570  ;;  %1340 = vmatpush3.msra.mxu0 %v931_v34  ;;  %v963_v36 = vld [vmem:[#allocation2 + $0x330] sm:$0xff] }
 0x15c   : > { %575 = vst.msk [vmem:[#allocation2 + $0x328] sm:$0xff] %vm171_vm0, %v571_v35  ;;  %1378 = vmatpush3.msra.mxu1 %v963_v36 }
 0x15e   : > { %v505_v37 = vpop.permute.xlu0 %504  ;;  %v946_v38 = vld [vmem:[#allocation2 + $0x2a8] sm:$0xff] }
 0x15f   : > { %510 = vst.msk [vmem:[#allocation2 + $0x2a0] sm:$0xff] %vm171_vm0, %v505_v37  ;;  %v633_v39 = vpop.permute.xlu1 %632  ;;  %1341 = vmatprep.subr.mxu0 %v946_v38  ;;  %v978_v40 = vld [vmem:[#allocation2 + $0x3a8] sm:$0xff] }
 0x160   : > { %638 = vst.msk [vmem:[#allocation2 + $0x3a0] sm:$0xff] %vm171_vm0, %v633_v39  ;;  %1379 = vmatprep.subr.mxu1 %v978_v40 }
 0x162   : > { %v441_v41 = vpop.permute.xlu0 %440  ;;  %v930_v42 = vld [vmem:[#allocation2 + $0x228] sm:$0xff] }
 0x163   : > { %446 = vst.msk [vmem:[#allocation2 + $0x220] sm:$0xff] %vm171_vm0, %v441_v41  ;;  %v569_v43 = vpop.permute.xlu1 %568  ;;  %1342 = vmatpush3.msra.mxu0 %v930_v42  ;;  %v962_v44 = vld [vmem:[#allocation2 + $0x328] sm:$0xff] }
 0x164   : > { %574 = vst.msk [vmem:[#allocation2 + $0x320] sm:$0xff] %vm171_vm0, %v569_v43  ;;  %1380 = vmatpush3.msra.mxu1 %v962_v44 }
 0x166   : > { %v499_v45 = vpop.permute.xlu0 %498  ;;  %v945_v46 = vld [vmem:[#allocation2 + $0x2a0] sm:$0xff] }
 0x167   : > { %503 = vst.msk [vmem:[#allocation2 + $0x298] sm:$0xff] %vm171_vm0, %v499_v45  ;;  %v627_v47 = vpop.permute.xlu1 %626  ;;  %1343 = vmatprep.subr.mxu0 %v945_v46  ;;  %v977_v48 = vld [vmem:[#allocation2 + $0x3a0] sm:$0xff] }
 0x168   : > { %631 = vst.msk [vmem:[#allocation2 + $0x398] sm:$0xff] %vm171_vm0, %v627_v47  ;;  %1381 = vmatprep.subr.mxu1 %v977_v48 }
 0x16a   : > { %v435_v49 = vpop.permute.xlu0 %434  ;;  %v929_v50 = vld [vmem:[#allocation2 + $0x220] sm:$0xff] }
 0x16b   : > { %439 = vst.msk [vmem:[#allocation2 + $0x218] sm:$0xff] %vm171_vm0, %v435_v49  ;;  %v563_v51 = vpop.permute.xlu1 %562  ;;  %1344 = vmatpush3.msra.mxu0 %v929_v50  ;;  %v961_v52 = vld [vmem:[#allocation2 + $0x320] sm:$0xff] }
 0x16c   : > { %567 = vst.msk [vmem:[#allocation2 + $0x318] sm:$0xff] %vm171_vm0, %v563_v51  ;;  %1382 = vmatpush3.msra.mxu1 %v961_v52 }
 0x16e   : > { %v497_v53 = vpop.permute.xlu0 %496  ;;  %v944_v54 = vld [vmem:[#allocation2 + $0x298] sm:$0xff] }
 0x16f   : > { %502 = vst.msk [vmem:[#allocation2 + $0x290] sm:$0xff] %vm171_vm0, %v497_v53  ;;  %v625_v55 = vpop.permute.xlu1 %624  ;;  %1345 = vmatprep.subr.mxu0 %v944_v54  ;;  %v976_v56 = vld [vmem:[#allocation2 + $0x398] sm:$0xff] }
 0x170   : > { %630 = vst.msk [vmem:[#allocation2 + $0x390] sm:$0xff] %vm171_vm0, %v625_v55  ;;  %1383 = vmatprep.subr.mxu1 %v976_v56 }
 0x172   : > { %v433_v57 = vpop.permute.xlu0 %432  ;;  %v928_v58 = vld [vmem:[#allocation2 + $0x218] sm:$0xff] }
 0x173   : > { %438 = vst.msk [vmem:[#allocation2 + $0x210] sm:$0xff] %vm171_vm0, %v433_v57  ;;  %v561_v59 = vpop.permute.xlu1 %560  ;;  %1346 = vmatpush3.msra.mxu0 %v928_v58  ;;  %v960_v60 = vld [vmem:[#allocation2 + $0x318] sm:$0xff] }
 0x174   : > { %566 = vst.msk [vmem:[#allocation2 + $0x310] sm:$0xff] %vm171_vm0, %v561_v59  ;;  %1384 = vmatpush3.msra.mxu1 %v960_v60 }
 0x176   : > { %v491_v61 = vpop.permute.xlu0 %490  ;;  %v943_v62 = vld [vmem:[#allocation2 + $0x290] sm:$0xff] }
 0x177   : > { %495 = vst.msk [vmem:[#allocation2 + $0x288] sm:$0xff] %vm171_vm0, %v491_v61  ;;  %v619_v63 = vpop.permute.xlu1 %618  ;;  %1347 = vmatprep.subr.mxu0 %v943_v62  ;;  %v975_v0 = vld [vmem:[#allocation2 + $0x390] sm:$0xff] }
 0x178   : > { %623 = vst.msk [vmem:[#allocation2 + $0x388] sm:$0xff] %vm171_vm0, %v619_v63  ;;  %1385 = vmatprep.subr.mxu1 %v975_v0 }
 0x17a   : > { %v555_v1 = vpop.permute.xlu0 %554  ;;  %v927_v4 = vld [vmem:[#allocation2 + $0x210] sm:$0xff] }
 0x17b   : > { %559 = vst.msk [vmem:[#allocation2 + $0x308] sm:$0xff] %vm171_vm0, %v555_v1  ;;  %v489_v5 = vpop.permute.xlu1 %488  ;;  %1348 = vmatpush3.msra.mxu0 %v927_v4  ;;  %v959_v6 = vld [vmem:[#allocation2 + $0x310] sm:$0xff] }
 0x17c   : > { %494 = vst.msk [vmem:[#allocation2 + $0x280] sm:$0xff] %vm171_vm0, %v489_v5  ;;  %1386 = vmatpush3.msra.mxu1 %v959_v6 }
 0x17e   : > { %v617_v8 = vpop.permute.xlu0 %616  ;;  %v942_v9 = vld [vmem:[#allocation2 + $0x288] sm:$0xff] }
 0x17f   : > { %622 = vst.msk [vmem:[#allocation2 + $0x380] sm:$0xff] %vm171_vm0, %v617_v8  ;;  %v553_v10 = vpop.permute.xlu1 %552  ;;  %1349 = vmatprep.subr.mxu0 %v942_v9  ;;  %v974_v11 = vld [vmem:[#allocation2 + $0x388] sm:$0xff] }
 0x180   : > { %558 = vst.msk [vmem:[#allocation2 + $0x300] sm:$0xff] %vm171_vm0, %v553_v10  ;;  %1387 = vmatprep.subr.mxu1 %v974_v11  ;;  %1350 = vmatpush3.msra.mxu0 %v926_v7 }
 0x182   : > { %v958_v12 = vld [vmem:[#allocation2 + $0x308] sm:$0xff] }
 0x183   : > { %1388 = vmatpush3.msra.mxu1 %v958_v12  ;;  %v941_v14 = vld [vmem:[#allocation2 + $0x280] sm:$0xff] }
 0x184   : > { %1351 = vmatprep.subr.mxu0 %v941_v14 }
 0x185   : > { %1352 = vmatpush3.msra.mxu0 %v925_v13 }
 0x186   : > { %1054 = vmatmul.mubr.f32.vlgmr.msra.gmra.mxu0 %v1230_v2  ;;  %v973_v16 = vld [vmem:[#allocation2 + $0x380] sm:$0xff] }
 0x187   : > { %1389 = vmatprep.subr.mxu1 %v973_v16  ;;  %v957_v18 = vld [vmem:[#allocation2 + $0x300] sm:$0xff]  ;;  %1058 = vmatprep.mubr.f32.mxu0 %v1235_v15 }
 0x188   : > { %1390 = vmatpush3.msra.mxu1 %v957_v18 }
 0x189   : > { %1129 = vmatmul.mubr.f32.vlgmr.msra.gmra.mxu1 %v1232_v17 }
 0x18a   : > { %1059 = vmatmul.mubr.f32.gmra.mxu0 %v1234_v19  ;;  %1133 = vmatprep.mubr.f32.mxu1 %v1237_v20 }
 0x18b   : > { %v685_v38 = vpop.permute.xlu0 %684 }
 0x18c   : > { %v690_v47 = vpop.permute.xlu1 %689 }
 0x18d   : > { %1134 = vmatmul.mubr.f32.gmra.mxu1 %v1236_v21 }
 0x1c9   : > { %v1277_v22 = vpop.f32.mrf.mxu0 }
 0x1cb   : > { %v1278_v3 = vpop.f32.mrf.mxu0 }
 0x1cc   : > { %v1279_v28 = vadd.f32 %v1278_v3, %v1277_v22 }
 0x1cd   : > { %v1315_v23 = vpop.f32.mrf.mxu1 }
 0x1ce   : > { %v1280_v24 = vpop.f32.mrf.mxu0 }
 0x1cf   : > { %v1316_v25 = vpop.f32.mrf.mxu1 }
 0x1d0   : > { %v1281_v26 = vpop.f32.mrf.mxu0  ;;  %v1317_v29 = vadd.f32 %v1316_v25, %v1315_v23 }
 0x1d1   : > { %v1318_v27 = vpop.f32.mrf.mxu1  ;;  %v1282_v35 = vadd.f32 %v1281_v26, %v1280_v24 }
 0x1d2   : > { %v906_v34 = vadd.f32 %v1317_v29, %v1279_v28 }
 0x1d3   : > { %v1319_v31 = vpop.f32.mrf.mxu1 }
 0x1d4   : > { %v1320_v36 = vadd.f32 %v1319_v31, %v1318_v27  ;;  %v914_v44 = vadd.f32 %v906_v34, %v685_v38 }
 0x1d6   : > { %v911_v45 = vadd.f32 %v1320_v36, %v1282_v35 }
 0x1d8   : > { %v915_v52 = vadd.f32 %v911_v45, %v690_v47 }
 0x246   : > { %v1353_v30 = vpop.f32.mrf.mxu0 }
 0x248   : > { %v1354_v32 = vpop.f32.mrf.mxu0 }
 0x249   : > { %v1391_v33 = vpop.f32.mrf.mxu1  ;;  %v1355_v40 = vadd.f32 %v1354_v32, %v1353_v30 }
 0x24a   : > { %v1356_v37 = vpop.f32.mrf.mxu0 }
 0x24b   : > { %v1392_v39 = vpop.f32.mrf.mxu1 }
 0x24c   : > { %v1393_v41 = vadd.f32 %v1392_v39, %v1391_v33  ;;  %v1357_v42 = vpop.f32.mrf.mxu0 }
 0x24d   : > { %v1394_v43 = vpop.f32.mrf.mxu1  ;;  %v1358_v50 = vadd.f32 %v1357_v42, %v1356_v37 }
 0x24e   : > { %v1131_v46 = vadd.f32 %v1393_v41, %v1355_v40 }
 0x24f   : > { %v1395_v48 = vpop.f32.mrf.mxu1 }
 0x250   : > { %v1139_v49 = vadd.f32 %v1131_v46, %v914_v44  ;;  %v1396_v51 = vadd.f32 %v1395_v48, %v1394_v43 }
 0x252   : > { %v1141_v53 = vmax.f32 %v1139_v49, 0.0  ;;  %v1136_v54 = vadd.f32 %v1396_v51, %v1358_v50 }
 0x254   : > { %1143 = vst.msk [vmem:[%s163_s24] sm:$0xff] %vm171_vm0, %v1141_v53  ;;  %v1140_v55 = vadd.f32 %v1136_v54, %v915_v52 }
 0x256   : > { %v1142_v56 = vmax.f32 %v1140_v55, 0.0 }
 0x258   : > { %1144 = vst.msk [vmem:[%s163_s24 + $0x8] sm:$0xff] %vm171_vm0, %v1142_v56 }
 0x259   : > { %1485 = shalt.err (!%p1482_p3)
}
 0x25a   : > { %s1486_s11 = scalar_lea.hbm %s2090_s6, 256  ;;  %s1490_s25 = scalar_lea.hbm %s2138_s3, 512 }
 0x25b   : > { %p1487_p4 = scmp.ne.s32.totalorder %s2090_s6, %s1486_s11  ;;  %p1491_p9 = scmp.lt.s32.totalorder %s2090_s6, %s2138_s3 }
 0x25c   : > { %p1492_p10 = scmp.lt.s32.totalorder %s1490_s25, %s1486_s11 }
 0x25d   : > { %p1488_p7 = pnand %p1487_p4, %p1627_p5 }
 0x25e   : > { %p1493_p11 = por %p1492_p10, %p1491_p9 }
 0x25f   : > { %p1489_p8 = pneg %p1488_p7 }
 0x261   : > { %p1494_p12 = pnand %p1493_p11, %p1489_p8 }
 0x263   : > { %1497 = shalt.err (!%p1494_p12)
}
 0x264   : > { %s1567_s28 = smov 128   ;;  %s1568_s29 = smov 8  }
 0x265   : > { %1397 = dma.vmem_to_hbm [thread:$0]  (%p1627_p5), %s2092_s30, 256, %s2090_s6, %s2095_s7, %s1567_s28, %s1567_s28, %s1568_s29  }
 0x266 PF: > { %p1403_p13 = scmp.ge.s32.totalorder %s1532_s15, 2  ;;  %s1174_s19 = sand.u32 1, %s1520_s12  }
 0x267   : > { %s1175_s24 = scalar_lea.sflag [#allocation4], %s1174_s19 }
 0x268   : > { %p1400_p0 = pnand %p1403_p13, %p1631_p6 }
 0x26a   : > { %p1401_p1 = pneg %p1400_p0 }
 0x26c   : > { %1515 = dma.done.wait (%p1401_p1), %s1175_s24, 256  }
 0x26d   : > { %1517 = vsyncadd (%p1401_p1), %s1175_s24, 4294967040  ;;  %p13_p2 = scmp.ge.s32.totalorder %s1614_s18, 4   ;;  %s2192_s12 = smov %s1524_s13 }
 0x26e   : > { %s2193_s13 = smov %s1528_s14  ;;  %s2194_s14 = smov %s1625_s21 }
 0x26f   : > { %s2195_s15 = smov %s1614_s18  ;;  %15 = sbr.rel (!%p13_p2) target bundleno = 3 (0x3), region = 70 }
 0x274   :  { %1180 = vsyncpa [#allocation4], 1 }
 0x275   :  { %1182 = vsyncpa [#allocation4 + $0x1], 1 }

</bundles_post_ra>
